<compile_context>
chip_gen: v7x
topology: tpu7x:2x2x1
jax: 0.10.0
libtpu: 0.0.40
codegen_flags: <defaults>
</compile_context>

<pallas_src>
import functools
import math

import jax
import jax.numpy as jnp
from jax.experimental import pallas as pl
from jax.experimental.pallas import tpu as pltpu


# ---------------------------------------------------------------------------
# Fused kernel: all encoder layers + final fc, one (S, H) sequence per step
# ---------------------------------------------------------------------------
def fused_transformer_kernel(x_ref,
                             wq_ref, bq_ref, wk_ref, bk_ref, wv_ref, bv_ref,
                             wo_ref, bo_ref,
                             ln1g_ref, ln1b_ref,
                             w1_ref, b1_ref, w2_ref, b2_ref,
                             ln2g_ref, ln2b_ref,
                             fcw_ref, fcb_ref,
                             o_ref, *, num_layers, num_heads):
    x = x_ref[0].astype(jnp.float32)                        # (S, H)
    S, H = x.shape

    for l in range(num_layers):                              # static unroll
        # ---- self attention: per-head weights, accumulate through out-proj --
        # (1/sqrt(hd) already folded into wq/bq at init time)
        attn = jnp.zeros((S, H), jnp.float32)
        for h in range(num_heads):                           # static unroll
            qh = jnp.dot(x, wq_ref[l, h],
                         preferred_element_type=jnp.float32) + bq_ref[l, h]
            kh = jnp.dot(x, wk_ref[l, h],
                         preferred_element_type=jnp.float32) + bk_ref[l, h]
            vh = jnp.dot(x, wv_ref[l, h],
                         preferred_element_type=jnp.float32) + bv_ref[l, h]
            # scores = qh @ kh^T without an explicit transpose
            s = jax.lax.dot_general(
                qh, kh, (((1,), (1,)), ((), ())),
                preferred_element_type=jnp.float32)
            s = s - jnp.max(s, axis=-1, keepdims=True)
            p = jnp.exp(s)
            denom = jnp.sum(p, axis=-1, keepdims=True)
            p = p * pl.reciprocal(denom, approx=True)
            head = jnp.dot(p, vh, preferred_element_type=jnp.float32)
            attn = attn + jnp.dot(head, wo_ref[l, h],
                                  preferred_element_type=jnp.float32)
        attn = attn + bo_ref[l]

        # ---- residual + layernorm 1 (post-norm, eps=1e-5) --------------------
        y = x + attn
        mu = jnp.mean(y, axis=-1, keepdims=True)
        var = jnp.mean((y - mu) ** 2, axis=-1, keepdims=True)
        y = (y - mu) * jax.lax.rsqrt(var + 1e-5) * ln1g_ref[l] + ln1b_ref[l]

        # ---- feed forward (H -> H -> H, ReLU) --------------------------------
        h1 = jnp.dot(y, w1_ref[l], preferred_element_type=jnp.float32) + b1_ref[l]
        h1 = jnp.maximum(h1, 0.0)
        h2 = jnp.dot(h1, w2_ref[l], preferred_element_type=jnp.float32) + b2_ref[l]

        # ---- residual + layernorm 2 ------------------------------------------
        z = y + h2
        mu2 = jnp.mean(z, axis=-1, keepdims=True)
        var2 = jnp.mean((z - mu2) ** 2, axis=-1, keepdims=True)
        x = (z - mu2) * jax.lax.rsqrt(var2 + 1e-5) * ln2g_ref[l] + ln2b_ref[l]

    # ---- final fc (token-wise), fused into the same kernel -------------------
    o_ref[0] = (jnp.dot(x, fcw_ref[...], preferred_element_type=jnp.float32)
                + fcb_ref[...]).astype(o_ref.dtype)


# ---------------------------------------------------------------------------
# Wrapper
# ---------------------------------------------------------------------------
def transformer_classifier_forward(tokens, params, num_heads):
    # embedding lookup + positional encoding (plain-JAX glue, one-shot gather)
    emb = params["embedding"][tokens]                        # (B, S, H)
    B, S = tokens.shape
    H = emb.shape[-1]
    x = emb + params["pos_enc"][:S][None, :, :]

    flat_weights = params["flat_weights"]
    O = flat_weights[-2].shape[-1]                           # fc_w_t: (H, O)

    kernel = functools.partial(fused_transformer_kernel,
                               num_layers=params["num_layers"],
                               num_heads=num_heads)
    # Weights: full-array blocks, constant index_map -> fetched once, stay in VMEM.
    weight_specs = [
        pl.BlockSpec(w.shape, lambda b, n=w.ndim: (0,) * n)
        for w in flat_weights
    ]
    return pl.pallas_call(
        kernel,
        out_shape=jax.ShapeDtypeStruct((B, S, O), jnp.float32),
        grid=(B,),
        in_specs=[pl.BlockSpec((1, S, H), lambda b: (b, 0, 0))] + weight_specs,
        out_specs=pl.BlockSpec((1, S, O), lambda b: (b, 0, 0)),
        compiler_params=pltpu.CompilerParams(
            dimension_semantics=("parallel",)),
    )(x, *flat_weights)


# ---------------------------------------------------------------------------
# Parameter setup (deterministic, synthetic; PyTorch-layout then pre-permuted)
# ---------------------------------------------------------------------------
def positional_encoding(max_len, d_model):
    position = jnp.arange(max_len, dtype=jnp.float32)[:, None]
    div_term = jnp.exp(jnp.arange(0, d_model, 2, dtype=jnp.float32)
                       * (-jnp.log(10000.0) / d_model))
    enc = jnp.zeros((max_len, d_model), jnp.float32)
    enc = enc.at[:, 0::2].set(jnp.sin(position * div_term))
    enc = enc.at[:, 1::2].set(jnp.cos(position * div_term))
    return enc


def init_params(key, vocab, H, O, num_layers, num_heads, max_len=1500):
    hd = H // num_heads
    scale = 1.0 / math.sqrt(hd)
    keys = jax.random.split(key, 2 + 6 * num_layers)
    ki = iter(keys)

    params = {"num_layers": num_layers}
    params["embedding"] = 0.02 * jax.random.normal(next(ki), (vocab, H), jnp.float32)
    params["pos_enc"] = positional_encoding(max_len, H)      # precomputed once

    wq_l, bq_l, wk_l, bk_l, wv_l, bv_l = [], [], [], [], [], []
    wo_l, bo_l = [], []
    ln1g_l, ln1b_l, ln2g_l, ln2b_l = [], [], [], []
    w1_l, b1_l, w2_l, b2_l = [], [], [], []

    for _ in range(num_layers):
        # PyTorch nn.MultiheadAttention / nn.TransformerEncoderLayer layout
        in_proj_w = 0.05 * jax.random.normal(next(ki), (3 * H, H), jnp.float32)
        in_proj_b = 0.01 * jax.random.normal(next(ki), (3 * H,), jnp.float32)
        out_proj_w = 0.05 * jax.random.normal(next(ki), (H, H), jnp.float32)
        out_proj_b = 0.01 * jax.random.normal(next(ki), (H,), jnp.float32)
        lin1_w = 0.05 * jax.random.normal(next(ki), (H, H), jnp.float32)
        lin2_w = 0.05 * jax.random.normal(next(ki), (H, H), jnp.float32)
        lin1_b = jnp.zeros((H,), jnp.float32)
        lin2_b = jnp.zeros((H,), jnp.float32)
        ln1_g = jnp.ones((H,), jnp.float32)
        ln1_b = jnp.zeros((H,), jnp.float32)
        ln2_g = jnp.ones((H,), jnp.float32)
        ln2_b = jnp.zeros((H,), jnp.float32)

        Wq, Wk, Wv = in_proj_w[0:H], in_proj_w[H:2 * H], in_proj_w[2 * H:3 * H]
        bq, bk, bv = in_proj_b[0:H], in_proj_b[H:2 * H], in_proj_b[2 * H:3 * H]

        # per-head weights pre-permuted at init (free): q_h = x @ wq[h] + bq[h]
        # attention scale 1/sqrt(hd) folded into Wq / bq here (mathematically
        # identical to scaling the scores).
        wq_l.append(scale * Wq.reshape(num_heads, hd, H).transpose(0, 2, 1))  # (NH, H, hd)
        wk_l.append(Wk.reshape(num_heads, hd, H).transpose(0, 2, 1))
        wv_l.append(Wv.reshape(num_heads, hd, H).transpose(0, 2, 1))
        bq_l.append(scale * bq.reshape(num_heads, 1, hd))
        bk_l.append(bk.reshape(num_heads, 1, hd))
        bv_l.append(bv.reshape(num_heads, 1, hd))
        # out-projection split per head: attn += head_h @ wo[h]
        wo_l.append(out_proj_w.T.reshape(num_heads, hd, H))                   # (NH, hd, H)
        bo_l.append(out_proj_b.reshape(1, H))

        ln1g_l.append(ln1_g.reshape(1, H)); ln1b_l.append(ln1_b.reshape(1, H))
        ln2g_l.append(ln2_g.reshape(1, H)); ln2b_l.append(ln2_b.reshape(1, H))
        w1_l.append(lin1_w.T); b1_l.append(lin1_b.reshape(1, H))
        w2_l.append(lin2_w.T); b2_l.append(lin2_b.reshape(1, H))

    fc_w = 0.05 * jax.random.normal(next(ki), (O, H), jnp.float32)
    fc_b = jnp.zeros((O,), jnp.float32)

    stack = lambda lst: jnp.stack(lst, axis=0)               # leading layer dim
    params["flat_weights"] = [
        stack(wq_l), stack(bq_l), stack(wk_l), stack(bk_l),
        stack(wv_l), stack(bv_l), stack(wo_l), stack(bo_l),
        stack(ln1g_l), stack(ln1b_l),
        stack(w1_l), stack(b1_l), stack(w2_l), stack(b2_l),
        stack(ln2g_l), stack(ln2b_l),
        fc_w.T,                                              # (H, O)
        fc_b.reshape(1, O),
    ]
    return params


# ---------------------------------------------------------------------------
if __name__ == "__main__":
    VOCAB = 50        # input_dim
    HIDDEN = 32       # hidden_dim (also dim_feedforward per the spec)
    OUT = 4           # output_dim
    NUM_LAYERS = 2
    NUM_HEADS = 4
    BATCH = 2
    SEQ = 8

    key = jax.random.PRNGKey(0)
    k_tok, k_par = jax.random.split(key)
    tokens = jax.random.randint(k_tok, (BATCH, SEQ), 0, VOCAB, dtype=jnp.int32)
    params = init_params(k_par, VOCAB, HIDDEN, OUT, NUM_LAYERS, NUM_HEADS)

    out = transformer_classifier_forward(tokens, params, NUM_HEADS)
    out = jax.block_until_ready(out)
    assert out.shape == (BATCH, SEQ, OUT)
    print("KERNEL_OK")
</pallas_src>

<mosaic_0001>
module attributes {stable_mosaic.version = 11 : i64} {
  func.func @fused_transformer_kernel(%arg0: i32, %arg1: memref<1x8x32xf32, #tpu.memory_space<vmem>>, %arg2: memref<2x4x32x8xf32, #tpu.memory_space<vmem>>, %arg3: memref<2x4x1x8xf32, #tpu.memory_space<vmem>>, %arg4: memref<2x4x32x8xf32, #tpu.memory_space<vmem>>, %arg5: memref<2x4x1x8xf32, #tpu.memory_space<vmem>>, %arg6: memref<2x4x32x8xf32, #tpu.memory_space<vmem>>, %arg7: memref<2x4x1x8xf32, #tpu.memory_space<vmem>>, %arg8: memref<2x4x8x32xf32, #tpu.memory_space<vmem>>, %arg9: memref<2x1x32xf32, #tpu.memory_space<vmem>>, %arg10: memref<2x1x32xf32, #tpu.memory_space<vmem>>, %arg11: memref<2x1x32xf32, #tpu.memory_space<vmem>>, %arg12: memref<2x32x32xf32, #tpu.memory_space<vmem>>, %arg13: memref<2x1x32xf32, #tpu.memory_space<vmem>>, %arg14: memref<2x32x32xf32, #tpu.memory_space<vmem>>, %arg15: memref<2x1x32xf32, #tpu.memory_space<vmem>>, %arg16: memref<2x1x32xf32, #tpu.memory_space<vmem>>, %arg17: memref<2x1x32xf32, #tpu.memory_space<vmem>>, %arg18: memref<32x4xf32, #tpu.memory_space<vmem>>, %arg19: memref<1x4xf32, #tpu.memory_space<vmem>>, %arg20: memref<1x8x4xf32, #tpu.memory_space<vmem>>) attributes {dimension_semantics = [#tpu.dimension_semantics<parallel>], iteration_bounds = array<i64: 2>, scalar_prefetch = 0 : i64, scratch_operands = 0 : i64, tpu.core_type = #tpu.core_type<tc>, window_params = [{transform_indices = @transform_0, window_bounds = array<i64: 1, 8, 32>}, {pipeline_mode = #tpu.pipeline_mode<synchronous>, transform_indices = @transform_1, window_bounds = array<i64: 2, 4, 32, 8>}, {pipeline_mode = #tpu.pipeline_mode<synchronous>, transform_indices = @transform_2, window_bounds = array<i64: 2, 4, 1, 8>}, {pipeline_mode = #tpu.pipeline_mode<synchronous>, transform_indices = @transform_3, window_bounds = array<i64: 2, 4, 32, 8>}, {pipeline_mode = #tpu.pipeline_mode<synchronous>, transform_indices = @transform_4, window_bounds = array<i64: 2, 4, 1, 8>}, {pipeline_mode = #tpu.pipeline_mode<synchronous>, transform_indices = @transform_5, window_bounds = array<i64: 2, 4, 32, 8>}, {pipeline_mode = #tpu.pipeline_mode<synchronous>, transform_indices = @transform_6, window_bounds = array<i64: 2, 4, 1, 8>}, {pipeline_mode = #tpu.pipeline_mode<synchronous>, transform_indices = @transform_7, window_bounds = array<i64: 2, 4, 8, 32>}, {pipeline_mode = #tpu.pipeline_mode<synchronous>, transform_indices = @transform_8, window_bounds = array<i64: 2, 1, 32>}, {pipeline_mode = #tpu.pipeline_mode<synchronous>, transform_indices = @transform_9, window_bounds = array<i64: 2, 1, 32>}, {pipeline_mode = #tpu.pipeline_mode<synchronous>, transform_indices = @transform_10, window_bounds = array<i64: 2, 1, 32>}, {pipeline_mode = #tpu.pipeline_mode<synchronous>, transform_indices = @transform_11, window_bounds = array<i64: 2, 32, 32>}, {pipeline_mode = #tpu.pipeline_mode<synchronous>, transform_indices = @transform_12, window_bounds = array<i64: 2, 1, 32>}, {pipeline_mode = #tpu.pipeline_mode<synchronous>, transform_indices = @transform_13, window_bounds = array<i64: 2, 32, 32>}, {pipeline_mode = #tpu.pipeline_mode<synchronous>, transform_indices = @transform_14, window_bounds = array<i64: 2, 1, 32>}, {pipeline_mode = #tpu.pipeline_mode<synchronous>, transform_indices = @transform_15, window_bounds = array<i64: 2, 1, 32>}, {pipeline_mode = #tpu.pipeline_mode<synchronous>, transform_indices = @transform_16, window_bounds = array<i64: 2, 1, 32>}, {pipeline_mode = #tpu.pipeline_mode<synchronous>, transform_indices = @transform_17, window_bounds = array<i64: 32, 4>}, {pipeline_mode = #tpu.pipeline_mode<synchronous>, transform_indices = @transform_18, window_bounds = array<i64: 1, 4>}, {transform_indices = @transform_19, window_bounds = array<i64: 1, 8, 4>}]} {
    %c0 = arith.constant 0 : index
    %c0_0 = arith.constant 0 : index
    %c0_1 = arith.constant 0 : index
    %0 = vector.load %arg1[%c0, %c0_0, %c0_1] : memref<1x8x32xf32, #tpu.memory_space<vmem>>, vector<1x8x32xf32>
    %1 = vector.shape_cast %0 : vector<1x8x32xf32> to vector<8x32xf32>
    %cst = arith.constant 0.000000e+00 : f32
    %2 = vector.broadcast %cst : f32 to vector<8x32xf32>
    %c0_2 = arith.constant 0 : index
    %c0_3 = arith.constant 0 : index
    %c0_4 = arith.constant 0 : index
    %c0_5 = arith.constant 0 : index
    %3 = vector.load %arg2[%c0_2, %c0_3, %c0_4, %c0_5] : memref<2x4x32x8xf32, #tpu.memory_space<vmem>>, vector<1x1x32x8xf32>
    %4 = vector.shape_cast %3 : vector<1x1x32x8xf32> to vector<32x8xf32>
    %cst_6 = arith.constant dense<0.000000e+00> : vector<8x8xf32>
    %5 = tpu.matmul %1, %4, %cst_6 {dimension_numbers = #tpu.dot_dimension_numbers<[1], [0], [0], [1], [0, 0, 1, 1], [], []>} : vector<8x32xf32>, vector<32x8xf32>, vector<8x8xf32> -> vector<8x8xf32>
    %c0_7 = arith.constant 0 : index
    %c0_8 = arith.constant 0 : index
    %c0_9 = arith.constant 0 : index
    %c0_10 = arith.constant 0 : index
    %6 = vector.load %arg3[%c0_7, %c0_8, %c0_9, %c0_10] : memref<2x4x1x8xf32, #tpu.memory_space<vmem>>, vector<1x1x1x8xf32>
    %7 = vector.shape_cast %6 : vector<1x1x1x8xf32> to vector<1x8xf32>
    %8 = vector.broadcast %7 : vector<1x8xf32> to vector<8x8xf32>
    %9 = arith.addf %5, %8 : vector<8x8xf32>
    %c0_11 = arith.constant 0 : index
    %c0_12 = arith.constant 0 : index
    %c0_13 = arith.constant 0 : index
    %c0_14 = arith.constant 0 : index
    %10 = vector.load %arg4[%c0_11, %c0_12, %c0_13, %c0_14] : memref<2x4x32x8xf32, #tpu.memory_space<vmem>>, vector<1x1x32x8xf32>
    %11 = vector.shape_cast %10 : vector<1x1x32x8xf32> to vector<32x8xf32>
    %cst_15 = arith.constant dense<0.000000e+00> : vector<8x8xf32>
    %12 = tpu.matmul %1, %11, %cst_15 {dimension_numbers = #tpu.dot_dimension_numbers<[1], [0], [0], [1], [0, 0, 1, 1], [], []>} : vector<8x32xf32>, vector<32x8xf32>, vector<8x8xf32> -> vector<8x8xf32>
    %c0_16 = arith.constant 0 : index
    %c0_17 = arith.constant 0 : index
    %c0_18 = arith.constant 0 : index
    %c0_19 = arith.constant 0 : index
    %13 = vector.load %arg5[%c0_16, %c0_17, %c0_18, %c0_19] : memref<2x4x1x8xf32, #tpu.memory_space<vmem>>, vector<1x1x1x8xf32>
    %14 = vector.shape_cast %13 : vector<1x1x1x8xf32> to vector<1x8xf32>
    %15 = vector.broadcast %14 : vector<1x8xf32> to vector<8x8xf32>
    %16 = arith.addf %12, %15 : vector<8x8xf32>
    %c0_20 = arith.constant 0 : index
    %c0_21 = arith.constant 0 : index
    %c0_22 = arith.constant 0 : index
    %c0_23 = arith.constant 0 : index
    %17 = vector.load %arg6[%c0_20, %c0_21, %c0_22, %c0_23] : memref<2x4x32x8xf32, #tpu.memory_space<vmem>>, vector<1x1x32x8xf32>
    %18 = vector.shape_cast %17 : vector<1x1x32x8xf32> to vector<32x8xf32>
    %cst_24 = arith.constant dense<0.000000e+00> : vector<8x8xf32>
    %19 = tpu.matmul %1, %18, %cst_24 {dimension_numbers = #tpu.dot_dimension_numbers<[1], [0], [0], [1], [0, 0, 1, 1], [], []>} : vector<8x32xf32>, vector<32x8xf32>, vector<8x8xf32> -> vector<8x8xf32>
    %c0_25 = arith.constant 0 : index
    %c0_26 = arith.constant 0 : index
    %c0_27 = arith.constant 0 : index
    %c0_28 = arith.constant 0 : index
    %20 = vector.load %arg7[%c0_25, %c0_26, %c0_27, %c0_28] : memref<2x4x1x8xf32, #tpu.memory_space<vmem>>, vector<1x1x1x8xf32>
    %21 = vector.shape_cast %20 : vector<1x1x1x8xf32> to vector<1x8xf32>
    %22 = vector.broadcast %21 : vector<1x8xf32> to vector<8x8xf32>
    %23 = arith.addf %19, %22 : vector<8x8xf32>
    %cst_29 = arith.constant dense<0.000000e+00> : vector<8x8xf32>
    %24 = tpu.matmul %9, %16, %cst_29 {dimension_numbers = #tpu.dot_dimension_numbers<[1], [1], [0], [0], [0, 0, 1, 0], [], []>} : vector<8x8xf32>, vector<8x8xf32>, vector<8x8xf32> -> vector<8x8xf32>
    %cst_30 = arith.constant dense<0xFF800000> : vector<8xf32>
    %25 = vector.multi_reduction <maximumf>, %24, %cst_30 [1] : vector<8x8xf32> to vector<8xf32>
    %26 = vector.shape_cast %25 : vector<8xf32> to vector<8x1xf32>
    %27 = vector.broadcast %26 : vector<8x1xf32> to vector<8x8xf32>
    %28 = arith.subf %24, %27 : vector<8x8xf32>
    %29 = math.exp %28 : vector<8x8xf32>
    %cst_31 = arith.constant dense<0.000000e+00> : vector<8xf32>
    %30 = vector.multi_reduction <add>, %29, %cst_31 [1] : vector<8x8xf32> to vector<8xf32>
    %31 = vector.shape_cast %30 : vector<8xf32> to vector<8x1xf32>
    %32 = tpu.reciprocal %31 {approx = true} : vector<8x1xf32> -> vector<8x1xf32>
    %33 = vector.broadcast %32 : vector<8x1xf32> to vector<8x8xf32>
    %34 = arith.mulf %29, %33 : vector<8x8xf32>
    %cst_32 = arith.constant dense<0.000000e+00> : vector<8x8xf32>
    %35 = tpu.matmul %34, %23, %cst_32 {dimension_numbers = #tpu.dot_dimension_numbers<[1], [0], [0], [1], [0, 0, 1, 1], [], []>} : vector<8x8xf32>, vector<8x8xf32>, vector<8x8xf32> -> vector<8x8xf32>
    %c0_33 = arith.constant 0 : index
    %c0_34 = arith.constant 0 : index
    %c0_35 = arith.constant 0 : index
    %c0_36 = arith.constant 0 : index
    %36 = vector.load %arg8[%c0_33, %c0_34, %c0_35, %c0_36] : memref<2x4x8x32xf32, #tpu.memory_space<vmem>>, vector<1x1x8x32xf32>
    %37 = vector.shape_cast %36 : vector<1x1x8x32xf32> to vector<8x32xf32>
    %cst_37 = arith.constant dense<0.000000e+00> : vector<8x32xf32>
    %38 = tpu.matmul %35, %37, %cst_37 {dimension_numbers = #tpu.dot_dimension_numbers<[1], [0], [0], [1], [0, 0, 1, 1], [], []>} : vector<8x8xf32>, vector<8x32xf32>, vector<8x32xf32> -> vector<8x32xf32>
    %39 = arith.addf %2, %38 : vector<8x32xf32>
    %c0_38 = arith.constant 0 : index
    %c1 = arith.constant 1 : index
    %c0_39 = arith.constant 0 : index
    %c0_40 = arith.constant 0 : index
    %40 = vector.load %arg2[%c0_38, %c1, %c0_39, %c0_40] : memref<2x4x32x8xf32, #tpu.memory_space<vmem>>, vector<1x1x32x8xf32>
    %41 = vector.shape_cast %40 : vector<1x1x32x8xf32> to vector<32x8xf32>
    %cst_41 = arith.constant dense<0.000000e+00> : vector<8x8xf32>
    %42 = tpu.matmul %1, %41, %cst_41 {dimension_numbers = #tpu.dot_dimension_numbers<[1], [0], [0], [1], [0, 0, 1, 1], [], []>} : vector<8x32xf32>, vector<32x8xf32>, vector<8x8xf32> -> vector<8x8xf32>
    %c0_42 = arith.constant 0 : index
    %c1_43 = arith.constant 1 : index
    %c0_44 = arith.constant 0 : index
    %c0_45 = arith.constant 0 : index
    %43 = vector.load %arg3[%c0_42, %c1_43, %c0_44, %c0_45] : memref<2x4x1x8xf32, #tpu.memory_space<vmem>>, vector<1x1x1x8xf32>
    %44 = vector.shape_cast %43 : vector<1x1x1x8xf32> to vector<1x8xf32>
    %45 = vector.broadcast %44 : vector<1x8xf32> to vector<8x8xf32>
    %46 = arith.addf %42, %45 : vector<8x8xf32>
    %c0_46 = arith.constant 0 : index
    %c1_47 = arith.constant 1 : index
    %c0_48 = arith.constant 0 : index
    %c0_49 = arith.constant 0 : index
    %47 = vector.load %arg4[%c0_46, %c1_47, %c0_48, %c0_49] : memref<2x4x32x8xf32, #tpu.memory_space<vmem>>, vector<1x1x32x8xf32>
    %48 = vector.shape_cast %47 : vector<1x1x32x8xf32> to vector<32x8xf32>
    %cst_50 = arith.constant dense<0.000000e+00> : vector<8x8xf32>
    %49 = tpu.matmul %1, %48, %cst_50 {dimension_numbers = #tpu.dot_dimension_numbers<[1], [0], [0], [1], [0, 0, 1, 1], [], []>} : vector<8x32xf32>, vector<32x8xf32>, vector<8x8xf32> -> vector<8x8xf32>
    %c0_51 = arith.constant 0 : index
    %c1_52 = arith.constant 1 : index
    %c0_53 = arith.constant 0 : index
    %c0_54 = arith.constant 0 : index
    %50 = vector.load %arg5[%c0_51, %c1_52, %c0_53, %c0_54] : memref<2x4x1x8xf32, #tpu.memory_space<vmem>>, vector<1x1x1x8xf32>
    %51 = vector.shape_cast %50 : vector<1x1x1x8xf32> to vector<1x8xf32>
    %52 = vector.broadcast %51 : vector<1x8xf32> to vector<8x8xf32>
    %53 = arith.addf %49, %52 : vector<8x8xf32>
    %c0_55 = arith.constant 0 : index
    %c1_56 = arith.constant 1 : index
    %c0_57 = arith.constant 0 : index
    %c0_58 = arith.constant 0 : index
    %54 = vector.load %arg6[%c0_55, %c1_56, %c0_57, %c0_58] : memref<2x4x32x8xf32, #tpu.memory_space<vmem>>, vector<1x1x32x8xf32>
    %55 = vector.shape_cast %54 : vector<1x1x32x8xf32> to vector<32x8xf32>
    %cst_59 = arith.constant dense<0.000000e+00> : vector<8x8xf32>
    %56 = tpu.matmul %1, %55, %cst_59 {dimension_numbers = #tpu.dot_dimension_numbers<[1], [0], [0], [1], [0, 0, 1, 1], [], []>} : vector<8x32xf32>, vector<32x8xf32>, vector<8x8xf32> -> vector<8x8xf32>
    %c0_60 = arith.constant 0 : index
    %c1_61 = arith.constant 1 : index
    %c0_62 = arith.constant 0 : index
    %c0_63 = arith.constant 0 : index
    %57 = vector.load %arg7[%c0_60, %c1_61, %c0_62, %c0_63] : memref<2x4x1x8xf32, #tpu.memory_space<vmem>>, vector<1x1x1x8xf32>
    %58 = vector.shape_cast %57 : vector<1x1x1x8xf32> to vector<1x8xf32>
    %59 = vector.broadcast %58 : vector<1x8xf32> to vector<8x8xf32>
    %60 = arith.addf %56, %59 : vector<8x8xf32>
    %cst_64 = arith.constant dense<0.000000e+00> : vector<8x8xf32>
    %61 = tpu.matmul %46, %53, %cst_64 {dimension_numbers = #tpu.dot_dimension_numbers<[1], [1], [0], [0], [0, 0, 1, 0], [], []>} : vector<8x8xf32>, vector<8x8xf32>, vector<8x8xf32> -> vector<8x8xf32>
    %cst_65 = arith.constant dense<0xFF800000> : vector<8xf32>
    %62 = vector.multi_reduction <maximumf>, %61, %cst_65 [1] : vector<8x8xf32> to vector<8xf32>
    %63 = vector.shape_cast %62 : vector<8xf32> to vector<8x1xf32>
    %64 = vector.broadcast %63 : vector<8x1xf32> to vector<8x8xf32>
    %65 = arith.subf %61, %64 : vector<8x8xf32>
    %66 = math.exp %65 : vector<8x8xf32>
    %cst_66 = arith.constant dense<0.000000e+00> : vector<8xf32>
    %67 = vector.multi_reduction <add>, %66, %cst_66 [1] : vector<8x8xf32> to vector<8xf32>
    %68 = vector.shape_cast %67 : vector<8xf32> to vector<8x1xf32>
    %69 = tpu.reciprocal %68 {approx = true} : vector<8x1xf32> -> vector<8x1xf32>
    %70 = vector.broadcast %69 : vector<8x1xf32> to vector<8x8xf32>
    %71 = arith.mulf %66, %70 : vector<8x8xf32>
    %cst_67 = arith.constant dense<0.000000e+00> : vector<8x8xf32>
    %72 = tpu.matmul %71, %60, %cst_67 {dimension_numbers = #tpu.dot_dimension_numbers<[1], [0], [0], [1], [0, 0, 1, 1], [], []>} : vector<8x8xf32>, vector<8x8xf32>, vector<8x8xf32> -> vector<8x8xf32>
    %c0_68 = arith.constant 0 : index
    %c1_69 = arith.constant 1 : index
    %c0_70 = arith.constant 0 : index
    %c0_71 = arith.constant 0 : index
    %73 = vector.load %arg8[%c0_68, %c1_69, %c0_70, %c0_71] : memref<2x4x8x32xf32, #tpu.memory_space<vmem>>, vector<1x1x8x32xf32>
    %74 = vector.shape_cast %73 : vector<1x1x8x32xf32> to vector<8x32xf32>
    %cst_72 = arith.constant dense<0.000000e+00> : vector<8x32xf32>
    %75 = tpu.matmul %72, %74, %cst_72 {dimension_numbers = #tpu.dot_dimension_numbers<[1], [0], [0], [1], [0, 0, 1, 1], [], []>} : vector<8x8xf32>, vector<8x32xf32>, vector<8x32xf32> -> vector<8x32xf32>
    %76 = arith.addf %39, %75 : vector<8x32xf32>
    %c0_73 = arith.constant 0 : index
    %c2 = arith.constant 2 : index
    %c0_74 = arith.constant 0 : index
    %c0_75 = arith.constant 0 : index
    %77 = vector.load %arg2[%c0_73, %c2, %c0_74, %c0_75] : memref<2x4x32x8xf32, #tpu.memory_space<vmem>>, vector<1x1x32x8xf32>
    %78 = vector.shape_cast %77 : vector<1x1x32x8xf32> to vector<32x8xf32>
    %cst_76 = arith.constant dense<0.000000e+00> : vector<8x8xf32>
    %79 = tpu.matmul %1, %78, %cst_76 {dimension_numbers = #tpu.dot_dimension_numbers<[1], [0], [0], [1], [0, 0, 1, 1], [], []>} : vector<8x32xf32>, vector<32x8xf32>, vector<8x8xf32> -> vector<8x8xf32>
    %c0_77 = arith.constant 0 : index
    %c2_78 = arith.constant 2 : index
    %c0_79 = arith.constant 0 : index
    %c0_80 = arith.constant 0 : index
    %80 = vector.load %arg3[%c0_77, %c2_78, %c0_79, %c0_80] : memref<2x4x1x8xf32, #tpu.memory_space<vmem>>, vector<1x1x1x8xf32>
    %81 = vector.shape_cast %80 : vector<1x1x1x8xf32> to vector<1x8xf32>
    %82 = vector.broadcast %81 : vector<1x8xf32> to vector<8x8xf32>
    %83 = arith.addf %79, %82 : vector<8x8xf32>
    %c0_81 = arith.constant 0 : index
    %c2_82 = arith.constant 2 : index
    %c0_83 = arith.constant 0 : index
    %c0_84 = arith.constant 0 : index
    %84 = vector.load %arg4[%c0_81, %c2_82, %c0_83, %c0_84] : memref<2x4x32x8xf32, #tpu.memory_space<vmem>>, vector<1x1x32x8xf32>
    %85 = vector.shape_cast %84 : vector<1x1x32x8xf32> to vector<32x8xf32>
    %cst_85 = arith.constant dense<0.000000e+00> : vector<8x8xf32>
    %86 = tpu.matmul %1, %85, %cst_85 {dimension_numbers = #tpu.dot_dimension_numbers<[1], [0], [0], [1], [0, 0, 1, 1], [], []>} : vector<8x32xf32>, vector<32x8xf32>, vector<8x8xf32> -> vector<8x8xf32>
    %c0_86 = arith.constant 0 : index
    %c2_87 = arith.constant 2 : index
    %c0_88 = arith.constant 0 : index
    %c0_89 = arith.constant 0 : index
    %87 = vector.load %arg5[%c0_86, %c2_87, %c0_88, %c0_89] : memref<2x4x1x8xf32, #tpu.memory_space<vmem>>, vector<1x1x1x8xf32>
    %88 = vector.shape_cast %87 : vector<1x1x1x8xf32> to vector<1x8xf32>
    %89 = vector.broadcast %88 : vector<1x8xf32> to vector<8x8xf32>
    %90 = arith.addf %86, %89 : vector<8x8xf32>
    %c0_90 = arith.constant 0 : index
    %c2_91 = arith.constant 2 : index
    %c0_92 = arith.constant 0 : index
    %c0_93 = arith.constant 0 : index
    %91 = vector.load %arg6[%c0_90, %c2_91, %c0_92, %c0_93] : memref<2x4x32x8xf32, #tpu.memory_space<vmem>>, vector<1x1x32x8xf32>
    %92 = vector.shape_cast %91 : vector<1x1x32x8xf32> to vector<32x8xf32>
    %cst_94 = arith.constant dense<0.000000e+00> : vector<8x8xf32>
    %93 = tpu.matmul %1, %92, %cst_94 {dimension_numbers = #tpu.dot_dimension_numbers<[1], [0], [0], [1], [0, 0, 1, 1], [], []>} : vector<8x32xf32>, vector<32x8xf32>, vector<8x8xf32> -> vector<8x8xf32>
    %c0_95 = arith.constant 0 : index
    %c2_96 = arith.constant 2 : index
    %c0_97 = arith.constant 0 : index
    %c0_98 = arith.constant 0 : index
    %94 = vector.load %arg7[%c0_95, %c2_96, %c0_97, %c0_98] : memref<2x4x1x8xf32, #tpu.memory_space<vmem>>, vector<1x1x1x8xf32>
    %95 = vector.shape_cast %94 : vector<1x1x1x8xf32> to vector<1x8xf32>
    %96 = vector.broadcast %95 : vector<1x8xf32> to vector<8x8xf32>
    %97 = arith.addf %93, %96 : vector<8x8xf32>
    %cst_99 = arith.constant dense<0.000000e+00> : vector<8x8xf32>
    %98 = tpu.matmul %83, %90, %cst_99 {dimension_numbers = #tpu.dot_dimension_numbers<[1], [1], [0], [0], [0, 0, 1, 0], [], []>} : vector<8x8xf32>, vector<8x8xf32>, vector<8x8xf32> -> vector<8x8xf32>
    %cst_100 = arith.constant dense<0xFF800000> : vector<8xf32>
    %99 = vector.multi_reduction <maximumf>, %98, %cst_100 [1] : vector<8x8xf32> to vector<8xf32>
    %100 = vector.shape_cast %99 : vector<8xf32> to vector<8x1xf32>
    %101 = vector.broadcast %100 : vector<8x1xf32> to vector<8x8xf32>
    %102 = arith.subf %98, %101 : vector<8x8xf32>
    %103 = math.exp %102 : vector<8x8xf32>
    %cst_101 = arith.constant dense<0.000000e+00> : vector<8xf32>
    %104 = vector.multi_reduction <add>, %103, %cst_101 [1] : vector<8x8xf32> to vector<8xf32>
    %105 = vector.shape_cast %104 : vector<8xf32> to vector<8x1xf32>
    %106 = tpu.reciprocal %105 {approx = true} : vector<8x1xf32> -> vector<8x1xf32>
    %107 = vector.broadcast %106 : vector<8x1xf32> to vector<8x8xf32>
    %108 = arith.mulf %103, %107 : vector<8x8xf32>
    %cst_102 = arith.constant dense<0.000000e+00> : vector<8x8xf32>
    %109 = tpu.matmul %108, %97, %cst_102 {dimension_numbers = #tpu.dot_dimension_numbers<[1], [0], [0], [1], [0, 0, 1, 1], [], []>} : vector<8x8xf32>, vector<8x8xf32>, vector<8x8xf32> -> vector<8x8xf32>
    %c0_103 = arith.constant 0 : index
    %c2_104 = arith.constant 2 : index
    %c0_105 = arith.constant 0 : index
    %c0_106 = arith.constant 0 : index
    %110 = vector.load %arg8[%c0_103, %c2_104, %c0_105, %c0_106] : memref<2x4x8x32xf32, #tpu.memory_space<vmem>>, vector<1x1x8x32xf32>
    %111 = vector.shape_cast %110 : vector<1x1x8x32xf32> to vector<8x32xf32>
    %cst_107 = arith.constant dense<0.000000e+00> : vector<8x32xf32>
    %112 = tpu.matmul %109, %111, %cst_107 {dimension_numbers = #tpu.dot_dimension_numbers<[1], [0], [0], [1], [0, 0, 1, 1], [], []>} : vector<8x8xf32>, vector<8x32xf32>, vector<8x32xf32> -> vector<8x32xf32>
    %113 = arith.addf %76, %112 : vector<8x32xf32>
    %c0_108 = arith.constant 0 : index
    %c3 = arith.constant 3 : index
    %c0_109 = arith.constant 0 : index
    %c0_110 = arith.constant 0 : index
    %114 = vector.load %arg2[%c0_108, %c3, %c0_109, %c0_110] : memref<2x4x32x8xf32, #tpu.memory_space<vmem>>, vector<1x1x32x8xf32>
    %115 = vector.shape_cast %114 : vector<1x1x32x8xf32> to vector<32x8xf32>
    %cst_111 = arith.constant dense<0.000000e+00> : vector<8x8xf32>
    %116 = tpu.matmul %1, %115, %cst_111 {dimension_numbers = #tpu.dot_dimension_numbers<[1], [0], [0], [1], [0, 0, 1, 1], [], []>} : vector<8x32xf32>, vector<32x8xf32>, vector<8x8xf32> -> vector<8x8xf32>
    %c0_112 = arith.constant 0 : index
    %c3_113 = arith.constant 3 : index
    %c0_114 = arith.constant 0 : index
    %c0_115 = arith.constant 0 : index
    %117 = vector.load %arg3[%c0_112, %c3_113, %c0_114, %c0_115] : memref<2x4x1x8xf32, #tpu.memory_space<vmem>>, vector<1x1x1x8xf32>
    %118 = vector.shape_cast %117 : vector<1x1x1x8xf32> to vector<1x8xf32>
    %119 = vector.broadcast %118 : vector<1x8xf32> to vector<8x8xf32>
    %120 = arith.addf %116, %119 : vector<8x8xf32>
    %c0_116 = arith.constant 0 : index
    %c3_117 = arith.constant 3 : index
    %c0_118 = arith.constant 0 : index
    %c0_119 = arith.constant 0 : index
    %121 = vector.load %arg4[%c0_116, %c3_117, %c0_118, %c0_119] : memref<2x4x32x8xf32, #tpu.memory_space<vmem>>, vector<1x1x32x8xf32>
    %122 = vector.shape_cast %121 : vector<1x1x32x8xf32> to vector<32x8xf32>
    %cst_120 = arith.constant dense<0.000000e+00> : vector<8x8xf32>
    %123 = tpu.matmul %1, %122, %cst_120 {dimension_numbers = #tpu.dot_dimension_numbers<[1], [0], [0], [1], [0, 0, 1, 1], [], []>} : vector<8x32xf32>, vector<32x8xf32>, vector<8x8xf32> -> vector<8x8xf32>
    %c0_121 = arith.constant 0 : index
    %c3_122 = arith.constant 3 : index
    %c0_123 = arith.constant 0 : index
    %c0_124 = arith.constant 0 : index
    %124 = vector.load %arg5[%c0_121, %c3_122, %c0_123, %c0_124] : memref<2x4x1x8xf32, #tpu.memory_space<vmem>>, vector<1x1x1x8xf32>
    %125 = vector.shape_cast %124 : vector<1x1x1x8xf32> to vector<1x8xf32>
    %126 = vector.broadcast %125 : vector<1x8xf32> to vector<8x8xf32>
    %127 = arith.addf %123, %126 : vector<8x8xf32>
    %c0_125 = arith.constant 0 : index
    %c3_126 = arith.constant 3 : index
    %c0_127 = arith.constant 0 : index
    %c0_128 = arith.constant 0 : index
    %128 = vector.load %arg6[%c0_125, %c3_126, %c0_127, %c0_128] : memref<2x4x32x8xf32, #tpu.memory_space<vmem>>, vector<1x1x32x8xf32>
    %129 = vector.shape_cast %128 : vector<1x1x32x8xf32> to vector<32x8xf32>
    %cst_129 = arith.constant dense<0.000000e+00> : vector<8x8xf32>
    %130 = tpu.matmul %1, %129, %cst_129 {dimension_numbers = #tpu.dot_dimension_numbers<[1], [0], [0], [1], [0, 0, 1, 1], [], []>} : vector<8x32xf32>, vector<32x8xf32>, vector<8x8xf32> -> vector<8x8xf32>
    %c0_130 = arith.constant 0 : index
    %c3_131 = arith.constant 3 : index
    %c0_132 = arith.constant 0 : index
    %c0_133 = arith.constant 0 : index
    %131 = vector.load %arg7[%c0_130, %c3_131, %c0_132, %c0_133] : memref<2x4x1x8xf32, #tpu.memory_space<vmem>>, vector<1x1x1x8xf32>
    %132 = vector.shape_cast %131 : vector<1x1x1x8xf32> to vector<1x8xf32>
    %133 = vector.broadcast %132 : vector<1x8xf32> to vector<8x8xf32>
    %134 = arith.addf %130, %133 : vector<8x8xf32>
    %cst_134 = arith.constant dense<0.000000e+00> : vector<8x8xf32>
    %135 = tpu.matmul %120, %127, %cst_134 {dimension_numbers = #tpu.dot_dimension_numbers<[1], [1], [0], [0], [0, 0, 1, 0], [], []>} : vector<8x8xf32>, vector<8x8xf32>, vector<8x8xf32> -> vector<8x8xf32>
    %cst_135 = arith.constant dense<0xFF800000> : vector<8xf32>
    %136 = vector.multi_reduction <maximumf>, %135, %cst_135 [1] : vector<8x8xf32> to vector<8xf32>
    %137 = vector.shape_cast %136 : vector<8xf32> to vector<8x1xf32>
    %138 = vector.broadcast %137 : vector<8x1xf32> to vector<8x8xf32>
    %139 = arith.subf %135, %138 : vector<8x8xf32>
    %140 = math.exp %139 : vector<8x8xf32>
    %cst_136 = arith.constant dense<0.000000e+00> : vector<8xf32>
    %141 = vector.multi_reduction <add>, %140, %cst_136 [1] : vector<8x8xf32> to vector<8xf32>
    %142 = vector.shape_cast %141 : vector<8xf32> to vector<8x1xf32>
    %143 = tpu.reciprocal %142 {approx = true} : vector<8x1xf32> -> vector<8x1xf32>
    %144 = vector.broadcast %143 : vector<8x1xf32> to vector<8x8xf32>
    %145 = arith.mulf %140, %144 : vector<8x8xf32>
    %cst_137 = arith.constant dense<0.000000e+00> : vector<8x8xf32>
    %146 = tpu.matmul %145, %134, %cst_137 {dimension_numbers = #tpu.dot_dimension_numbers<[1], [0], [0], [1], [0, 0, 1, 1], [], []>} : vector<8x8xf32>, vector<8x8xf32>, vector<8x8xf32> -> vector<8x8xf32>
    %c0_138 = arith.constant 0 : index
    %c3_139 = arith.constant 3 : index
    %c0_140 = arith.constant 0 : index
    %c0_141 = arith.constant 0 : index
    %147 = vector.load %arg8[%c0_138, %c3_139, %c0_140, %c0_141] : memref<2x4x8x32xf32, #tpu.memory_space<vmem>>, vector<1x1x8x32xf32>
    %148 = vector.shape_cast %147 : vector<1x1x8x32xf32> to vector<8x32xf32>
    %cst_142 = arith.constant dense<0.000000e+00> : vector<8x32xf32>
    %149 = tpu.matmul %146, %148, %cst_142 {dimension_numbers = #tpu.dot_dimension_numbers<[1], [0], [0], [1], [0, 0, 1, 1], [], []>} : vector<8x8xf32>, vector<8x32xf32>, vector<8x32xf32> -> vector<8x32xf32>
    %150 = arith.addf %113, %149 : vector<8x32xf32>
    %c0_143 = arith.constant 0 : index
    %c0_144 = arith.constant 0 : index
    %c0_145 = arith.constant 0 : index
    %151 = vector.load %arg9[%c0_143, %c0_144, %c0_145] : memref<2x1x32xf32, #tpu.memory_space<vmem>>, vector<1x1x32xf32>
    %152 = vector.shape_cast %151 : vector<1x1x32xf32> to vector<1x32xf32>
    %153 = vector.broadcast %152 : vector<1x32xf32> to vector<8x32xf32>
    %154 = arith.addf %150, %153 : vector<8x32xf32>
    %155 = arith.addf %1, %154 : vector<8x32xf32>
    %cst_146 = arith.constant dense<0.000000e+00> : vector<8xf32>
    %156 = vector.multi_reduction <add>, %155, %cst_146 [1] : vector<8x32xf32> to vector<8xf32>
    %157 = vector.shape_cast %156 : vector<8xf32> to vector<8x1xf32>
    %cst_147 = arith.constant 3.200000e+01 : f32
    %158 = vector.broadcast %cst_147 : f32 to vector<8x1xf32>
    %159 = arith.divf %157, %158 : vector<8x1xf32>
    %160 = vector.broadcast %159 : vector<8x1xf32> to vector<8x32xf32>
    %161 = arith.subf %155, %160 : vector<8x32xf32>
    %162 = arith.mulf %161, %161 : vector<8x32xf32>
    %cst_148 = arith.constant dense<0.000000e+00> : vector<8xf32>
    %163 = vector.multi_reduction <add>, %162, %cst_148 [1] : vector<8x32xf32> to vector<8xf32>
    %164 = vector.shape_cast %163 : vector<8xf32> to vector<8x1xf32>
    %cst_149 = arith.constant 3.200000e+01 : f32
    %165 = vector.broadcast %cst_149 : f32 to vector<8x1xf32>
    %166 = arith.divf %164, %165 : vector<8x1xf32>
    %167 = vector.broadcast %159 : vector<8x1xf32> to vector<8x32xf32>
    %168 = arith.subf %155, %167 : vector<8x32xf32>
    %cst_150 = arith.constant 9.99999974E-6 : f32
    %169 = vector.broadcast %cst_150 : f32 to vector<8x1xf32>
    %170 = arith.addf %166, %169 : vector<8x1xf32>
    %171 = math.rsqrt %170 : vector<8x1xf32>
    %172 = vector.broadcast %171 : vector<8x1xf32> to vector<8x32xf32>
    %173 = arith.mulf %168, %172 : vector<8x32xf32>
    %c0_151 = arith.constant 0 : index
    %c0_152 = arith.constant 0 : index
    %c0_153 = arith.constant 0 : index
    %174 = vector.load %arg10[%c0_151, %c0_152, %c0_153] : memref<2x1x32xf32, #tpu.memory_space<vmem>>, vector<1x1x32xf32>
    %175 = vector.shape_cast %174 : vector<1x1x32xf32> to vector<1x32xf32>
    %176 = vector.broadcast %175 : vector<1x32xf32> to vector<8x32xf32>
    %177 = arith.mulf %173, %176 : vector<8x32xf32>
    %c0_154 = arith.constant 0 : index
    %c0_155 = arith.constant 0 : index
    %c0_156 = arith.constant 0 : index
    %178 = vector.load %arg11[%c0_154, %c0_155, %c0_156] : memref<2x1x32xf32, #tpu.memory_space<vmem>>, vector<1x1x32xf32>
    %179 = vector.shape_cast %178 : vector<1x1x32xf32> to vector<1x32xf32>
    %180 = vector.broadcast %179 : vector<1x32xf32> to vector<8x32xf32>
    %181 = arith.addf %177, %180 : vector<8x32xf32>
    %c0_157 = arith.constant 0 : index
    %c0_158 = arith.constant 0 : index
    %c0_159 = arith.constant 0 : index
    %182 = vector.load %arg12[%c0_157, %c0_158, %c0_159] : memref<2x32x32xf32, #tpu.memory_space<vmem>>, vector<1x32x32xf32>
    %183 = vector.shape_cast %182 : vector<1x32x32xf32> to vector<32x32xf32>
    %cst_160 = arith.constant dense<0.000000e+00> : vector<8x32xf32>
    %184 = tpu.matmul %181, %183, %cst_160 {dimension_numbers = #tpu.dot_dimension_numbers<[1], [0], [0], [1], [0, 0, 1, 1], [], []>} : vector<8x32xf32>, vector<32x32xf32>, vector<8x32xf32> -> vector<8x32xf32>
    %c0_161 = arith.constant 0 : index
    %c0_162 = arith.constant 0 : index
    %c0_163 = arith.constant 0 : index
    %185 = vector.load %arg13[%c0_161, %c0_162, %c0_163] : memref<2x1x32xf32, #tpu.memory_space<vmem>>, vector<1x1x32xf32>
    %186 = vector.shape_cast %185 : vector<1x1x32xf32> to vector<1x32xf32>
    %187 = vector.broadcast %186 : vector<1x32xf32> to vector<8x32xf32>
    %188 = arith.addf %184, %187 : vector<8x32xf32>
    %cst_164 = arith.constant 0.000000e+00 : f32
    %189 = vector.broadcast %cst_164 : f32 to vector<8x32xf32>
    %190 = arith.maximumf %188, %189 : vector<8x32xf32>
    %c0_165 = arith.constant 0 : index
    %c0_166 = arith.constant 0 : index
    %c0_167 = arith.constant 0 : index
    %191 = vector.load %arg14[%c0_165, %c0_166, %c0_167] : memref<2x32x32xf32, #tpu.memory_space<vmem>>, vector<1x32x32xf32>
    %192 = vector.shape_cast %191 : vector<1x32x32xf32> to vector<32x32xf32>
    %cst_168 = arith.constant dense<0.000000e+00> : vector<8x32xf32>
    %193 = tpu.matmul %190, %192, %cst_168 {dimension_numbers = #tpu.dot_dimension_numbers<[1], [0], [0], [1], [0, 0, 1, 1], [], []>} : vector<8x32xf32>, vector<32x32xf32>, vector<8x32xf32> -> vector<8x32xf32>
    %c0_169 = arith.constant 0 : index
    %c0_170 = arith.constant 0 : index
    %c0_171 = arith.constant 0 : index
    %194 = vector.load %arg15[%c0_169, %c0_170, %c0_171] : memref<2x1x32xf32, #tpu.memory_space<vmem>>, vector<1x1x32xf32>
    %195 = vector.shape_cast %194 : vector<1x1x32xf32> to vector<1x32xf32>
    %196 = vector.broadcast %195 : vector<1x32xf32> to vector<8x32xf32>
    %197 = arith.addf %193, %196 : vector<8x32xf32>
    %198 = arith.addf %181, %197 : vector<8x32xf32>
    %cst_172 = arith.constant dense<0.000000e+00> : vector<8xf32>
    %199 = vector.multi_reduction <add>, %198, %cst_172 [1] : vector<8x32xf32> to vector<8xf32>
    %200 = vector.shape_cast %199 : vector<8xf32> to vector<8x1xf32>
    %cst_173 = arith.constant 3.200000e+01 : f32
    %201 = vector.broadcast %cst_173 : f32 to vector<8x1xf32>
    %202 = arith.divf %200, %201 : vector<8x1xf32>
    %203 = vector.broadcast %202 : vector<8x1xf32> to vector<8x32xf32>
    %204 = arith.subf %198, %203 : vector<8x32xf32>
    %205 = arith.mulf %204, %204 : vector<8x32xf32>
    %cst_174 = arith.constant dense<0.000000e+00> : vector<8xf32>
    %206 = vector.multi_reduction <add>, %205, %cst_174 [1] : vector<8x32xf32> to vector<8xf32>
    %207 = vector.shape_cast %206 : vector<8xf32> to vector<8x1xf32>
    %cst_175 = arith.constant 3.200000e+01 : f32
    %208 = vector.broadcast %cst_175 : f32 to vector<8x1xf32>
    %209 = arith.divf %207, %208 : vector<8x1xf32>
    %210 = vector.broadcast %202 : vector<8x1xf32> to vector<8x32xf32>
    %211 = arith.subf %198, %210 : vector<8x32xf32>
    %cst_176 = arith.constant 9.99999974E-6 : f32
    %212 = vector.broadcast %cst_176 : f32 to vector<8x1xf32>
    %213 = arith.addf %209, %212 : vector<8x1xf32>
    %214 = math.rsqrt %213 : vector<8x1xf32>
    %215 = vector.broadcast %214 : vector<8x1xf32> to vector<8x32xf32>
    %216 = arith.mulf %211, %215 : vector<8x32xf32>
    %c0_177 = arith.constant 0 : index
    %c0_178 = arith.constant 0 : index
    %c0_179 = arith.constant 0 : index
    %217 = vector.load %arg16[%c0_177, %c0_178, %c0_179] : memref<2x1x32xf32, #tpu.memory_space<vmem>>, vector<1x1x32xf32>
    %218 = vector.shape_cast %217 : vector<1x1x32xf32> to vector<1x32xf32>
    %219 = vector.broadcast %218 : vector<1x32xf32> to vector<8x32xf32>
    %220 = arith.mulf %216, %219 : vector<8x32xf32>
    %c0_180 = arith.constant 0 : index
    %c0_181 = arith.constant 0 : index
    %c0_182 = arith.constant 0 : index
    %221 = vector.load %arg17[%c0_180, %c0_181, %c0_182] : memref<2x1x32xf32, #tpu.memory_space<vmem>>, vector<1x1x32xf32>
    %222 = vector.shape_cast %221 : vector<1x1x32xf32> to vector<1x32xf32>
    %223 = vector.broadcast %222 : vector<1x32xf32> to vector<8x32xf32>
    %224 = arith.addf %220, %223 : vector<8x32xf32>
    %cst_183 = arith.constant 0.000000e+00 : f32
    %225 = vector.broadcast %cst_183 : f32 to vector<8x32xf32>
    %c1_184 = arith.constant 1 : index
    %c0_185 = arith.constant 0 : index
    %c0_186 = arith.constant 0 : index
    %c0_187 = arith.constant 0 : index
    %226 = vector.load %arg2[%c1_184, %c0_185, %c0_186, %c0_187] : memref<2x4x32x8xf32, #tpu.memory_space<vmem>>, vector<1x1x32x8xf32>
    %227 = vector.shape_cast %226 : vector<1x1x32x8xf32> to vector<32x8xf32>
    %cst_188 = arith.constant dense<0.000000e+00> : vector<8x8xf32>
    %228 = tpu.matmul %224, %227, %cst_188 {dimension_numbers = #tpu.dot_dimension_numbers<[1], [0], [0], [1], [0, 0, 1, 1], [], []>} : vector<8x32xf32>, vector<32x8xf32>, vector<8x8xf32> -> vector<8x8xf32>
    %c1_189 = arith.constant 1 : index
    %c0_190 = arith.constant 0 : index
    %c0_191 = arith.constant 0 : index
    %c0_192 = arith.constant 0 : index
    %229 = vector.load %arg3[%c1_189, %c0_190, %c0_191, %c0_192] : memref<2x4x1x8xf32, #tpu.memory_space<vmem>>, vector<1x1x1x8xf32>
    %230 = vector.shape_cast %229 : vector<1x1x1x8xf32> to vector<1x8xf32>
    %231 = vector.broadcast %230 : vector<1x8xf32> to vector<8x8xf32>
    %232 = arith.addf %228, %231 : vector<8x8xf32>
    %c1_193 = arith.constant 1 : index
    %c0_194 = arith.constant 0 : index
    %c0_195 = arith.constant 0 : index
    %c0_196 = arith.constant 0 : index
    %233 = vector.load %arg4[%c1_193, %c0_194, %c0_195, %c0_196] : memref<2x4x32x8xf32, #tpu.memory_space<vmem>>, vector<1x1x32x8xf32>
    %234 = vector.shape_cast %233 : vector<1x1x32x8xf32> to vector<32x8xf32>
    %cst_197 = arith.constant dense<0.000000e+00> : vector<8x8xf32>
    %235 = tpu.matmul %224, %234, %cst_197 {dimension_numbers = #tpu.dot_dimension_numbers<[1], [0], [0], [1], [0, 0, 1, 1], [], []>} : vector<8x32xf32>, vector<32x8xf32>, vector<8x8xf32> -> vector<8x8xf32>
    %c1_198 = arith.constant 1 : index
    %c0_199 = arith.constant 0 : index
    %c0_200 = arith.constant 0 : index
    %c0_201 = arith.constant 0 : index
    %236 = vector.load %arg5[%c1_198, %c0_199, %c0_200, %c0_201] : memref<2x4x1x8xf32, #tpu.memory_space<vmem>>, vector<1x1x1x8xf32>
    %237 = vector.shape_cast %236 : vector<1x1x1x8xf32> to vector<1x8xf32>
    %238 = vector.broadcast %237 : vector<1x8xf32> to vector<8x8xf32>
    %239 = arith.addf %235, %238 : vector<8x8xf32>
    %c1_202 = arith.constant 1 : index
    %c0_203 = arith.constant 0 : index
    %c0_204 = arith.constant 0 : index
    %c0_205 = arith.constant 0 : index
    %240 = vector.load %arg6[%c1_202, %c0_203, %c0_204, %c0_205] : memref<2x4x32x8xf32, #tpu.memory_space<vmem>>, vector<1x1x32x8xf32>
    %241 = vector.shape_cast %240 : vector<1x1x32x8xf32> to vector<32x8xf32>
    %cst_206 = arith.constant dense<0.000000e+00> : vector<8x8xf32>
    %242 = tpu.matmul %224, %241, %cst_206 {dimension_numbers = #tpu.dot_dimension_numbers<[1], [0], [0], [1], [0, 0, 1, 1], [], []>} : vector<8x32xf32>, vector<32x8xf32>, vector<8x8xf32> -> vector<8x8xf32>
    %c1_207 = arith.constant 1 : index
    %c0_208 = arith.constant 0 : index
    %c0_209 = arith.constant 0 : index
    %c0_210 = arith.constant 0 : index
    %243 = vector.load %arg7[%c1_207, %c0_208, %c0_209, %c0_210] : memref<2x4x1x8xf32, #tpu.memory_space<vmem>>, vector<1x1x1x8xf32>
    %244 = vector.shape_cast %243 : vector<1x1x1x8xf32> to vector<1x8xf32>
    %245 = vector.broadcast %244 : vector<1x8xf32> to vector<8x8xf32>
    %246 = arith.addf %242, %245 : vector<8x8xf32>
    %cst_211 = arith.constant dense<0.000000e+00> : vector<8x8xf32>
    %247 = tpu.matmul %232, %239, %cst_211 {dimension_numbers = #tpu.dot_dimension_numbers<[1], [1], [0], [0], [0, 0, 1, 0], [], []>} : vector<8x8xf32>, vector<8x8xf32>, vector<8x8xf32> -> vector<8x8xf32>
    %cst_212 = arith.constant dense<0xFF800000> : vector<8xf32>
    %248 = vector.multi_reduction <maximumf>, %247, %cst_212 [1] : vector<8x8xf32> to vector<8xf32>
    %249 = vector.shape_cast %248 : vector<8xf32> to vector<8x1xf32>
    %250 = vector.broadcast %249 : vector<8x1xf32> to vector<8x8xf32>
    %251 = arith.subf %247, %250 : vector<8x8xf32>
    %252 = math.exp %251 : vector<8x8xf32>
    %cst_213 = arith.constant dense<0.000000e+00> : vector<8xf32>
    %253 = vector.multi_reduction <add>, %252, %cst_213 [1] : vector<8x8xf32> to vector<8xf32>
    %254 = vector.shape_cast %253 : vector<8xf32> to vector<8x1xf32>
    %255 = tpu.reciprocal %254 {approx = true} : vector<8x1xf32> -> vector<8x1xf32>
    %256 = vector.broadcast %255 : vector<8x1xf32> to vector<8x8xf32>
    %257 = arith.mulf %252, %256 : vector<8x8xf32>
    %cst_214 = arith.constant dense<0.000000e+00> : vector<8x8xf32>
    %258 = tpu.matmul %257, %246, %cst_214 {dimension_numbers = #tpu.dot_dimension_numbers<[1], [0], [0], [1], [0, 0, 1, 1], [], []>} : vector<8x8xf32>, vector<8x8xf32>, vector<8x8xf32> -> vector<8x8xf32>
    %c1_215 = arith.constant 1 : index
    %c0_216 = arith.constant 0 : index
    %c0_217 = arith.constant 0 : index
    %c0_218 = arith.constant 0 : index
    %259 = vector.load %arg8[%c1_215, %c0_216, %c0_217, %c0_218] : memref<2x4x8x32xf32, #tpu.memory_space<vmem>>, vector<1x1x8x32xf32>
    %260 = vector.shape_cast %259 : vector<1x1x8x32xf32> to vector<8x32xf32>
    %cst_219 = arith.constant dense<0.000000e+00> : vector<8x32xf32>
    %261 = tpu.matmul %258, %260, %cst_219 {dimension_numbers = #tpu.dot_dimension_numbers<[1], [0], [0], [1], [0, 0, 1, 1], [], []>} : vector<8x8xf32>, vector<8x32xf32>, vector<8x32xf32> -> vector<8x32xf32>
    %262 = arith.addf %225, %261 : vector<8x32xf32>
    %c1_220 = arith.constant 1 : index
    %c1_221 = arith.constant 1 : index
    %c0_222 = arith.constant 0 : index
    %c0_223 = arith.constant 0 : index
    %263 = vector.load %arg2[%c1_220, %c1_221, %c0_222, %c0_223] : memref<2x4x32x8xf32, #tpu.memory_space<vmem>>, vector<1x1x32x8xf32>
    %264 = vector.shape_cast %263 : vector<1x1x32x8xf32> to vector<32x8xf32>
    %cst_224 = arith.constant dense<0.000000e+00> : vector<8x8xf32>
    %265 = tpu.matmul %224, %264, %cst_224 {dimension_numbers = #tpu.dot_dimension_numbers<[1], [0], [0], [1], [0, 0, 1, 1], [], []>} : vector<8x32xf32>, vector<32x8xf32>, vector<8x8xf32> -> vector<8x8xf32>
    %c1_225 = arith.constant 1 : index
    %c1_226 = arith.constant 1 : index
    %c0_227 = arith.constant 0 : index
    %c0_228 = arith.constant 0 : index
    %266 = vector.load %arg3[%c1_225, %c1_226, %c0_227, %c0_228] : memref<2x4x1x8xf32, #tpu.memory_space<vmem>>, vector<1x1x1x8xf32>
    %267 = vector.shape_cast %266 : vector<1x1x1x8xf32> to vector<1x8xf32>
    %268 = vector.broadcast %267 : vector<1x8xf32> to vector<8x8xf32>
    %269 = arith.addf %265, %268 : vector<8x8xf32>
    %c1_229 = arith.constant 1 : index
    %c1_230 = arith.constant 1 : index
    %c0_231 = arith.constant 0 : index
    %c0_232 = arith.constant 0 : index
    %270 = vector.load %arg4[%c1_229, %c1_230, %c0_231, %c0_232] : memref<2x4x32x8xf32, #tpu.memory_space<vmem>>, vector<1x1x32x8xf32>
    %271 = vector.shape_cast %270 : vector<1x1x32x8xf32> to vector<32x8xf32>
    %cst_233 = arith.constant dense<0.000000e+00> : vector<8x8xf32>
    %272 = tpu.matmul %224, %271, %cst_233 {dimension_numbers = #tpu.dot_dimension_numbers<[1], [0], [0], [1], [0, 0, 1, 1], [], []>} : vector<8x32xf32>, vector<32x8xf32>, vector<8x8xf32> -> vector<8x8xf32>
    %c1_234 = arith.constant 1 : index
    %c1_235 = arith.constant 1 : index
    %c0_236 = arith.constant 0 : index
    %c0_237 = arith.constant 0 : index
    %273 = vector.load %arg5[%c1_234, %c1_235, %c0_236, %c0_237] : memref<2x4x1x8xf32, #tpu.memory_space<vmem>>, vector<1x1x1x8xf32>
    %274 = vector.shape_cast %273 : vector<1x1x1x8xf32> to vector<1x8xf32>
    %275 = vector.broadcast %274 : vector<1x8xf32> to vector<8x8xf32>
    %276 = arith.addf %272, %275 : vector<8x8xf32>
    %c1_238 = arith.constant 1 : index
    %c1_239 = arith.constant 1 : index
    %c0_240 = arith.constant 0 : index
    %c0_241 = arith.constant 0 : index
    %277 = vector.load %arg6[%c1_238, %c1_239, %c0_240, %c0_241] : memref<2x4x32x8xf32, #tpu.memory_space<vmem>>, vector<1x1x32x8xf32>
    %278 = vector.shape_cast %277 : vector<1x1x32x8xf32> to vector<32x8xf32>
    %cst_242 = arith.constant dense<0.000000e+00> : vector<8x8xf32>
    %279 = tpu.matmul %224, %278, %cst_242 {dimension_numbers = #tpu.dot_dimension_numbers<[1], [0], [0], [1], [0, 0, 1, 1], [], []>} : vector<8x32xf32>, vector<32x8xf32>, vector<8x8xf32> -> vector<8x8xf32>
    %c1_243 = arith.constant 1 : index
    %c1_244 = arith.constant 1 : index
    %c0_245 = arith.constant 0 : index
    %c0_246 = arith.constant 0 : index
    %280 = vector.load %arg7[%c1_243, %c1_244, %c0_245, %c0_246] : memref<2x4x1x8xf32, #tpu.memory_space<vmem>>, vector<1x1x1x8xf32>
    %281 = vector.shape_cast %280 : vector<1x1x1x8xf32> to vector<1x8xf32>
    %282 = vector.broadcast %281 : vector<1x8xf32> to vector<8x8xf32>
    %283 = arith.addf %279, %282 : vector<8x8xf32>
    %cst_247 = arith.constant dense<0.000000e+00> : vector<8x8xf32>
    %284 = tpu.matmul %269, %276, %cst_247 {dimension_numbers = #tpu.dot_dimension_numbers<[1], [1], [0], [0], [0, 0, 1, 0], [], []>} : vector<8x8xf32>, vector<8x8xf32>, vector<8x8xf32> -> vector<8x8xf32>
    %cst_248 = arith.constant dense<0xFF800000> : vector<8xf32>
    %285 = vector.multi_reduction <maximumf>, %284, %cst_248 [1] : vector<8x8xf32> to vector<8xf32>
    %286 = vector.shape_cast %285 : vector<8xf32> to vector<8x1xf32>
    %287 = vector.broadcast %286 : vector<8x1xf32> to vector<8x8xf32>
    %288 = arith.subf %284, %287 : vector<8x8xf32>
    %289 = math.exp %288 : vector<8x8xf32>
    %cst_249 = arith.constant dense<0.000000e+00> : vector<8xf32>
    %290 = vector.multi_reduction <add>, %289, %cst_249 [1] : vector<8x8xf32> to vector<8xf32>
    %291 = vector.shape_cast %290 : vector<8xf32> to vector<8x1xf32>
    %292 = tpu.reciprocal %291 {approx = true} : vector<8x1xf32> -> vector<8x1xf32>
    %293 = vector.broadcast %292 : vector<8x1xf32> to vector<8x8xf32>
    %294 = arith.mulf %289, %293 : vector<8x8xf32>
    %cst_250 = arith.constant dense<0.000000e+00> : vector<8x8xf32>
    %295 = tpu.matmul %294, %283, %cst_250 {dimension_numbers = #tpu.dot_dimension_numbers<[1], [0], [0], [1], [0, 0, 1, 1], [], []>} : vector<8x8xf32>, vector<8x8xf32>, vector<8x8xf32> -> vector<8x8xf32>
    %c1_251 = arith.constant 1 : index
    %c1_252 = arith.constant 1 : index
    %c0_253 = arith.constant 0 : index
    %c0_254 = arith.constant 0 : index
    %296 = vector.load %arg8[%c1_251, %c1_252, %c0_253, %c0_254] : memref<2x4x8x32xf32, #tpu.memory_space<vmem>>, vector<1x1x8x32xf32>
    %297 = vector.shape_cast %296 : vector<1x1x8x32xf32> to vector<8x32xf32>
    %cst_255 = arith.constant dense<0.000000e+00> : vector<8x32xf32>
    %298 = tpu.matmul %295, %297, %cst_255 {dimension_numbers = #tpu.dot_dimension_numbers<[1], [0], [0], [1], [0, 0, 1, 1], [], []>} : vector<8x8xf32>, vector<8x32xf32>, vector<8x32xf32> -> vector<8x32xf32>
    %299 = arith.addf %262, %298 : vector<8x32xf32>
    %c1_256 = arith.constant 1 : index
    %c2_257 = arith.constant 2 : index
    %c0_258 = arith.constant 0 : index
    %c0_259 = arith.constant 0 : index
    %300 = vector.load %arg2[%c1_256, %c2_257, %c0_258, %c0_259] : memref<2x4x32x8xf32, #tpu.memory_space<vmem>>, vector<1x1x32x8xf32>
    %301 = vector.shape_cast %300 : vector<1x1x32x8xf32> to vector<32x8xf32>
    %cst_260 = arith.constant dense<0.000000e+00> : vector<8x8xf32>
    %302 = tpu.matmul %224, %301, %cst_260 {dimension_numbers = #tpu.dot_dimension_numbers<[1], [0], [0], [1], [0, 0, 1, 1], [], []>} : vector<8x32xf32>, vector<32x8xf32>, vector<8x8xf32> -> vector<8x8xf32>
    %c1_261 = arith.constant 1 : index
    %c2_262 = arith.constant 2 : index
    %c0_263 = arith.constant 0 : index
    %c0_264 = arith.constant 0 : index
    %303 = vector.load %arg3[%c1_261, %c2_262, %c0_263, %c0_264] : memref<2x4x1x8xf32, #tpu.memory_space<vmem>>, vector<1x1x1x8xf32>
    %304 = vector.shape_cast %303 : vector<1x1x1x8xf32> to vector<1x8xf32>
    %305 = vector.broadcast %304 : vector<1x8xf32> to vector<8x8xf32>
    %306 = arith.addf %302, %305 : vector<8x8xf32>
    %c1_265 = arith.constant 1 : index
    %c2_266 = arith.constant 2 : index
    %c0_267 = arith.constant 0 : index
    %c0_268 = arith.constant 0 : index
    %307 = vector.load %arg4[%c1_265, %c2_266, %c0_267, %c0_268] : memref<2x4x32x8xf32, #tpu.memory_space<vmem>>, vector<1x1x32x8xf32>
    %308 = vector.shape_cast %307 : vector<1x1x32x8xf32> to vector<32x8xf32>
    %cst_269 = arith.constant dense<0.000000e+00> : vector<8x8xf32>
    %309 = tpu.matmul %224, %308, %cst_269 {dimension_numbers = #tpu.dot_dimension_numbers<[1], [0], [0], [1], [0, 0, 1, 1], [], []>} : vector<8x32xf32>, vector<32x8xf32>, vector<8x8xf32> -> vector<8x8xf32>
    %c1_270 = arith.constant 1 : index
    %c2_271 = arith.constant 2 : index
    %c0_272 = arith.constant 0 : index
    %c0_273 = arith.constant 0 : index
    %310 = vector.load %arg5[%c1_270, %c2_271, %c0_272, %c0_273] : memref<2x4x1x8xf32, #tpu.memory_space<vmem>>, vector<1x1x1x8xf32>
    %311 = vector.shape_cast %310 : vector<1x1x1x8xf32> to vector<1x8xf32>
    %312 = vector.broadcast %311 : vector<1x8xf32> to vector<8x8xf32>
    %313 = arith.addf %309, %312 : vector<8x8xf32>
    %c1_274 = arith.constant 1 : index
    %c2_275 = arith.constant 2 : index
    %c0_276 = arith.constant 0 : index
    %c0_277 = arith.constant 0 : index
    %314 = vector.load %arg6[%c1_274, %c2_275, %c0_276, %c0_277] : memref<2x4x32x8xf32, #tpu.memory_space<vmem>>, vector<1x1x32x8xf32>
    %315 = vector.shape_cast %314 : vector<1x1x32x8xf32> to vector<32x8xf32>
    %cst_278 = arith.constant dense<0.000000e+00> : vector<8x8xf32>
    %316 = tpu.matmul %224, %315, %cst_278 {dimension_numbers = #tpu.dot_dimension_numbers<[1], [0], [0], [1], [0, 0, 1, 1], [], []>} : vector<8x32xf32>, vector<32x8xf32>, vector<8x8xf32> -> vector<8x8xf32>
    %c1_279 = arith.constant 1 : index
    %c2_280 = arith.constant 2 : index
    %c0_281 = arith.constant 0 : index
    %c0_282 = arith.constant 0 : index
    %317 = vector.load %arg7[%c1_279, %c2_280, %c0_281, %c0_282] : memref<2x4x1x8xf32, #tpu.memory_space<vmem>>, vector<1x1x1x8xf32>
    %318 = vector.shape_cast %317 : vector<1x1x1x8xf32> to vector<1x8xf32>
    %319 = vector.broadcast %318 : vector<1x8xf32> to vector<8x8xf32>
    %320 = arith.addf %316, %319 : vector<8x8xf32>
    %cst_283 = arith.constant dense<0.000000e+00> : vector<8x8xf32>
    %321 = tpu.matmul %306, %313, %cst_283 {dimension_numbers = #tpu.dot_dimension_numbers<[1], [1], [0], [0], [0, 0, 1, 0], [], []>} : vector<8x8xf32>, vector<8x8xf32>, vector<8x8xf32> -> vector<8x8xf32>
    %cst_284 = arith.constant dense<0xFF800000> : vector<8xf32>
    %322 = vector.multi_reduction <maximumf>, %321, %cst_284 [1] : vector<8x8xf32> to vector<8xf32>
    %323 = vector.shape_cast %322 : vector<8xf32> to vector<8x1xf32>
    %324 = vector.broadcast %323 : vector<8x1xf32> to vector<8x8xf32>
    %325 = arith.subf %321, %324 : vector<8x8xf32>
    %326 = math.exp %325 : vector<8x8xf32>
    %cst_285 = arith.constant dense<0.000000e+00> : vector<8xf32>
    %327 = vector.multi_reduction <add>, %326, %cst_285 [1] : vector<8x8xf32> to vector<8xf32>
    %328 = vector.shape_cast %327 : vector<8xf32> to vector<8x1xf32>
    %329 = tpu.reciprocal %328 {approx = true} : vector<8x1xf32> -> vector<8x1xf32>
    %330 = vector.broadcast %329 : vector<8x1xf32> to vector<8x8xf32>
    %331 = arith.mulf %326, %330 : vector<8x8xf32>
    %cst_286 = arith.constant dense<0.000000e+00> : vector<8x8xf32>
    %332 = tpu.matmul %331, %320, %cst_286 {dimension_numbers = #tpu.dot_dimension_numbers<[1], [0], [0], [1], [0, 0, 1, 1], [], []>} : vector<8x8xf32>, vector<8x8xf32>, vector<8x8xf32> -> vector<8x8xf32>
    %c1_287 = arith.constant 1 : index
    %c2_288 = arith.constant 2 : index
    %c0_289 = arith.constant 0 : index
    %c0_290 = arith.constant 0 : index
    %333 = vector.load %arg8[%c1_287, %c2_288, %c0_289, %c0_290] : memref<2x4x8x32xf32, #tpu.memory_space<vmem>>, vector<1x1x8x32xf32>
    %334 = vector.shape_cast %333 : vector<1x1x8x32xf32> to vector<8x32xf32>
    %cst_291 = arith.constant dense<0.000000e+00> : vector<8x32xf32>
    %335 = tpu.matmul %332, %334, %cst_291 {dimension_numbers = #tpu.dot_dimension_numbers<[1], [0], [0], [1], [0, 0, 1, 1], [], []>} : vector<8x8xf32>, vector<8x32xf32>, vector<8x32xf32> -> vector<8x32xf32>
    %336 = arith.addf %299, %335 : vector<8x32xf32>
    %c1_292 = arith.constant 1 : index
    %c3_293 = arith.constant 3 : index
    %c0_294 = arith.constant 0 : index
    %c0_295 = arith.constant 0 : index
    %337 = vector.load %arg2[%c1_292, %c3_293, %c0_294, %c0_295] : memref<2x4x32x8xf32, #tpu.memory_space<vmem>>, vector<1x1x32x8xf32>
    %338 = vector.shape_cast %337 : vector<1x1x32x8xf32> to vector<32x8xf32>
    %cst_296 = arith.constant dense<0.000000e+00> : vector<8x8xf32>
    %339 = tpu.matmul %224, %338, %cst_296 {dimension_numbers = #tpu.dot_dimension_numbers<[1], [0], [0], [1], [0, 0, 1, 1], [], []>} : vector<8x32xf32>, vector<32x8xf32>, vector<8x8xf32> -> vector<8x8xf32>
    %c1_297 = arith.constant 1 : index
    %c3_298 = arith.constant 3 : index
    %c0_299 = arith.constant 0 : index
    %c0_300 = arith.constant 0 : index
    %340 = vector.load %arg3[%c1_297, %c3_298, %c0_299, %c0_300] : memref<2x4x1x8xf32, #tpu.memory_space<vmem>>, vector<1x1x1x8xf32>
    %341 = vector.shape_cast %340 : vector<1x1x1x8xf32> to vector<1x8xf32>
    %342 = vector.broadcast %341 : vector<1x8xf32> to vector<8x8xf32>
    %343 = arith.addf %339, %342 : vector<8x8xf32>
    %c1_301 = arith.constant 1 : index
    %c3_302 = arith.constant 3 : index
    %c0_303 = arith.constant 0 : index
    %c0_304 = arith.constant 0 : index
    %344 = vector.load %arg4[%c1_301, %c3_302, %c0_303, %c0_304] : memref<2x4x32x8xf32, #tpu.memory_space<vmem>>, vector<1x1x32x8xf32>
    %345 = vector.shape_cast %344 : vector<1x1x32x8xf32> to vector<32x8xf32>
    %cst_305 = arith.constant dense<0.000000e+00> : vector<8x8xf32>
    %346 = tpu.matmul %224, %345, %cst_305 {dimension_numbers = #tpu.dot_dimension_numbers<[1], [0], [0], [1], [0, 0, 1, 1], [], []>} : vector<8x32xf32>, vector<32x8xf32>, vector<8x8xf32> -> vector<8x8xf32>
    %c1_306 = arith.constant 1 : index
    %c3_307 = arith.constant 3 : index
    %c0_308 = arith.constant 0 : index
    %c0_309 = arith.constant 0 : index
    %347 = vector.load %arg5[%c1_306, %c3_307, %c0_308, %c0_309] : memref<2x4x1x8xf32, #tpu.memory_space<vmem>>, vector<1x1x1x8xf32>
    %348 = vector.shape_cast %347 : vector<1x1x1x8xf32> to vector<1x8xf32>
    %349 = vector.broadcast %348 : vector<1x8xf32> to vector<8x8xf32>
    %350 = arith.addf %346, %349 : vector<8x8xf32>
    %c1_310 = arith.constant 1 : index
    %c3_311 = arith.constant 3 : index
    %c0_312 = arith.constant 0 : index
    %c0_313 = arith.constant 0 : index
    %351 = vector.load %arg6[%c1_310, %c3_311, %c0_312, %c0_313] : memref<2x4x32x8xf32, #tpu.memory_space<vmem>>, vector<1x1x32x8xf32>
    %352 = vector.shape_cast %351 : vector<1x1x32x8xf32> to vector<32x8xf32>
    %cst_314 = arith.constant dense<0.000000e+00> : vector<8x8xf32>
    %353 = tpu.matmul %224, %352, %cst_314 {dimension_numbers = #tpu.dot_dimension_numbers<[1], [0], [0], [1], [0, 0, 1, 1], [], []>} : vector<8x32xf32>, vector<32x8xf32>, vector<8x8xf32> -> vector<8x8xf32>
    %c1_315 = arith.constant 1 : index
    %c3_316 = arith.constant 3 : index
    %c0_317 = arith.constant 0 : index
    %c0_318 = arith.constant 0 : index
    %354 = vector.load %arg7[%c1_315, %c3_316, %c0_317, %c0_318] : memref<2x4x1x8xf32, #tpu.memory_space<vmem>>, vector<1x1x1x8xf32>
    %355 = vector.shape_cast %354 : vector<1x1x1x8xf32> to vector<1x8xf32>
    %356 = vector.broadcast %355 : vector<1x8xf32> to vector<8x8xf32>
    %357 = arith.addf %353, %356 : vector<8x8xf32>
    %cst_319 = arith.constant dense<0.000000e+00> : vector<8x8xf32>
    %358 = tpu.matmul %343, %350, %cst_319 {dimension_numbers = #tpu.dot_dimension_numbers<[1], [1], [0], [0], [0, 0, 1, 0], [], []>} : vector<8x8xf32>, vector<8x8xf32>, vector<8x8xf32> -> vector<8x8xf32>
    %cst_320 = arith.constant dense<0xFF800000> : vector<8xf32>
    %359 = vector.multi_reduction <maximumf>, %358, %cst_320 [1] : vector<8x8xf32> to vector<8xf32>
    %360 = vector.shape_cast %359 : vector<8xf32> to vector<8x1xf32>
    %361 = vector.broadcast %360 : vector<8x1xf32> to vector<8x8xf32>
    %362 = arith.subf %358, %361 : vector<8x8xf32>
    %363 = math.exp %362 : vector<8x8xf32>
    %cst_321 = arith.constant dense<0.000000e+00> : vector<8xf32>
    %364 = vector.multi_reduction <add>, %363, %cst_321 [1] : vector<8x8xf32> to vector<8xf32>
    %365 = vector.shape_cast %364 : vector<8xf32> to vector<8x1xf32>
    %366 = tpu.reciprocal %365 {approx = true} : vector<8x1xf32> -> vector<8x1xf32>
    %367 = vector.broadcast %366 : vector<8x1xf32> to vector<8x8xf32>
    %368 = arith.mulf %363, %367 : vector<8x8xf32>
    %cst_322 = arith.constant dense<0.000000e+00> : vector<8x8xf32>
    %369 = tpu.matmul %368, %357, %cst_322 {dimension_numbers = #tpu.dot_dimension_numbers<[1], [0], [0], [1], [0, 0, 1, 1], [], []>} : vector<8x8xf32>, vector<8x8xf32>, vector<8x8xf32> -> vector<8x8xf32>
    %c1_323 = arith.constant 1 : index
    %c3_324 = arith.constant 3 : index
    %c0_325 = arith.constant 0 : index
    %c0_326 = arith.constant 0 : index
    %370 = vector.load %arg8[%c1_323, %c3_324, %c0_325, %c0_326] : memref<2x4x8x32xf32, #tpu.memory_space<vmem>>, vector<1x1x8x32xf32>
    %371 = vector.shape_cast %370 : vector<1x1x8x32xf32> to vector<8x32xf32>
    %cst_327 = arith.constant dense<0.000000e+00> : vector<8x32xf32>
    %372 = tpu.matmul %369, %371, %cst_327 {dimension_numbers = #tpu.dot_dimension_numbers<[1], [0], [0], [1], [0, 0, 1, 1], [], []>} : vector<8x8xf32>, vector<8x32xf32>, vector<8x32xf32> -> vector<8x32xf32>
    %373 = arith.addf %336, %372 : vector<8x32xf32>
    %c1_328 = arith.constant 1 : index
    %c0_329 = arith.constant 0 : index
    %c0_330 = arith.constant 0 : index
    %374 = vector.load %arg9[%c1_328, %c0_329, %c0_330] : memref<2x1x32xf32, #tpu.memory_space<vmem>>, vector<1x1x32xf32>
    %375 = vector.shape_cast %374 : vector<1x1x32xf32> to vector<1x32xf32>
    %376 = vector.broadcast %375 : vector<1x32xf32> to vector<8x32xf32>
    %377 = arith.addf %373, %376 : vector<8x32xf32>
    %378 = arith.addf %224, %377 : vector<8x32xf32>
    %cst_331 = arith.constant dense<0.000000e+00> : vector<8xf32>
    %379 = vector.multi_reduction <add>, %378, %cst_331 [1] : vector<8x32xf32> to vector<8xf32>
    %380 = vector.shape_cast %379 : vector<8xf32> to vector<8x1xf32>
    %cst_332 = arith.constant 3.200000e+01 : f32
    %381 = vector.broadcast %cst_332 : f32 to vector<8x1xf32>
    %382 = arith.divf %380, %381 : vector<8x1xf32>
    %383 = vector.broadcast %382 : vector<8x1xf32> to vector<8x32xf32>
    %384 = arith.subf %378, %383 : vector<8x32xf32>
    %385 = arith.mulf %384, %384 : vector<8x32xf32>
    %cst_333 = arith.constant dense<0.000000e+00> : vector<8xf32>
    %386 = vector.multi_reduction <add>, %385, %cst_333 [1] : vector<8x32xf32> to vector<8xf32>
    %387 = vector.shape_cast %386 : vector<8xf32> to vector<8x1xf32>
    %cst_334 = arith.constant 3.200000e+01 : f32
    %388 = vector.broadcast %cst_334 : f32 to vector<8x1xf32>
    %389 = arith.divf %387, %388 : vector<8x1xf32>
    %390 = vector.broadcast %382 : vector<8x1xf32> to vector<8x32xf32>
    %391 = arith.subf %378, %390 : vector<8x32xf32>
    %cst_335 = arith.constant 9.99999974E-6 : f32
    %392 = vector.broadcast %cst_335 : f32 to vector<8x1xf32>
    %393 = arith.addf %389, %392 : vector<8x1xf32>
    %394 = math.rsqrt %393 : vector<8x1xf32>
    %395 = vector.broadcast %394 : vector<8x1xf32> to vector<8x32xf32>
    %396 = arith.mulf %391, %395 : vector<8x32xf32>
    %c1_336 = arith.constant 1 : index
    %c0_337 = arith.constant 0 : index
    %c0_338 = arith.constant 0 : index
    %397 = vector.load %arg10[%c1_336, %c0_337, %c0_338] : memref<2x1x32xf32, #tpu.memory_space<vmem>>, vector<1x1x32xf32>
    %398 = vector.shape_cast %397 : vector<1x1x32xf32> to vector<1x32xf32>
    %399 = vector.broadcast %398 : vector<1x32xf32> to vector<8x32xf32>
    %400 = arith.mulf %396, %399 : vector<8x32xf32>
    %c1_339 = arith.constant 1 : index
    %c0_340 = arith.constant 0 : index
    %c0_341 = arith.constant 0 : index
    %401 = vector.load %arg11[%c1_339, %c0_340, %c0_341] : memref<2x1x32xf32, #tpu.memory_space<vmem>>, vector<1x1x32xf32>
    %402 = vector.shape_cast %401 : vector<1x1x32xf32> to vector<1x32xf32>
    %403 = vector.broadcast %402 : vector<1x32xf32> to vector<8x32xf32>
    %404 = arith.addf %400, %403 : vector<8x32xf32>
    %c1_342 = arith.constant 1 : index
    %c0_343 = arith.constant 0 : index
    %c0_344 = arith.constant 0 : index
    %405 = vector.load %arg12[%c1_342, %c0_343, %c0_344] : memref<2x32x32xf32, #tpu.memory_space<vmem>>, vector<1x32x32xf32>
    %406 = vector.shape_cast %405 : vector<1x32x32xf32> to vector<32x32xf32>
    %cst_345 = arith.constant dense<0.000000e+00> : vector<8x32xf32>
    %407 = tpu.matmul %404, %406, %cst_345 {dimension_numbers = #tpu.dot_dimension_numbers<[1], [0], [0], [1], [0, 0, 1, 1], [], []>} : vector<8x32xf32>, vector<32x32xf32>, vector<8x32xf32> -> vector<8x32xf32>
    %c1_346 = arith.constant 1 : index
    %c0_347 = arith.constant 0 : index
    %c0_348 = arith.constant 0 : index
    %408 = vector.load %arg13[%c1_346, %c0_347, %c0_348] : memref<2x1x32xf32, #tpu.memory_space<vmem>>, vector<1x1x32xf32>
    %409 = vector.shape_cast %408 : vector<1x1x32xf32> to vector<1x32xf32>
    %410 = vector.broadcast %409 : vector<1x32xf32> to vector<8x32xf32>
    %411 = arith.addf %407, %410 : vector<8x32xf32>
    %cst_349 = arith.constant 0.000000e+00 : f32
    %412 = vector.broadcast %cst_349 : f32 to vector<8x32xf32>
    %413 = arith.maximumf %411, %412 : vector<8x32xf32>
    %c1_350 = arith.constant 1 : index
    %c0_351 = arith.constant 0 : index
    %c0_352 = arith.constant 0 : index
    %414 = vector.load %arg14[%c1_350, %c0_351, %c0_352] : memref<2x32x32xf32, #tpu.memory_space<vmem>>, vector<1x32x32xf32>
    %415 = vector.shape_cast %414 : vector<1x32x32xf32> to vector<32x32xf32>
    %cst_353 = arith.constant dense<0.000000e+00> : vector<8x32xf32>
    %416 = tpu.matmul %413, %415, %cst_353 {dimension_numbers = #tpu.dot_dimension_numbers<[1], [0], [0], [1], [0, 0, 1, 1], [], []>} : vector<8x32xf32>, vector<32x32xf32>, vector<8x32xf32> -> vector<8x32xf32>
    %c1_354 = arith.constant 1 : index
    %c0_355 = arith.constant 0 : index
    %c0_356 = arith.constant 0 : index
    %417 = vector.load %arg15[%c1_354, %c0_355, %c0_356] : memref<2x1x32xf32, #tpu.memory_space<vmem>>, vector<1x1x32xf32>
    %418 = vector.shape_cast %417 : vector<1x1x32xf32> to vector<1x32xf32>
    %419 = vector.broadcast %418 : vector<1x32xf32> to vector<8x32xf32>
    %420 = arith.addf %416, %419 : vector<8x32xf32>
    %421 = arith.addf %404, %420 : vector<8x32xf32>
    %cst_357 = arith.constant dense<0.000000e+00> : vector<8xf32>
    %422 = vector.multi_reduction <add>, %421, %cst_357 [1] : vector<8x32xf32> to vector<8xf32>
    %423 = vector.shape_cast %422 : vector<8xf32> to vector<8x1xf32>
    %cst_358 = arith.constant 3.200000e+01 : f32
    %424 = vector.broadcast %cst_358 : f32 to vector<8x1xf32>
    %425 = arith.divf %423, %424 : vector<8x1xf32>
    %426 = vector.broadcast %425 : vector<8x1xf32> to vector<8x32xf32>
    %427 = arith.subf %421, %426 : vector<8x32xf32>
    %428 = arith.mulf %427, %427 : vector<8x32xf32>
    %cst_359 = arith.constant dense<0.000000e+00> : vector<8xf32>
    %429 = vector.multi_reduction <add>, %428, %cst_359 [1] : vector<8x32xf32> to vector<8xf32>
    %430 = vector.shape_cast %429 : vector<8xf32> to vector<8x1xf32>
    %cst_360 = arith.constant 3.200000e+01 : f32
    %431 = vector.broadcast %cst_360 : f32 to vector<8x1xf32>
    %432 = arith.divf %430, %431 : vector<8x1xf32>
    %433 = vector.broadcast %425 : vector<8x1xf32> to vector<8x32xf32>
    %434 = arith.subf %421, %433 : vector<8x32xf32>
    %cst_361 = arith.constant 9.99999974E-6 : f32
    %435 = vector.broadcast %cst_361 : f32 to vector<8x1xf32>
    %436 = arith.addf %432, %435 : vector<8x1xf32>
    %437 = math.rsqrt %436 : vector<8x1xf32>
    %438 = vector.broadcast %437 : vector<8x1xf32> to vector<8x32xf32>
    %439 = arith.mulf %434, %438 : vector<8x32xf32>
    %c1_362 = arith.constant 1 : index
    %c0_363 = arith.constant 0 : index
    %c0_364 = arith.constant 0 : index
    %440 = vector.load %arg16[%c1_362, %c0_363, %c0_364] : memref<2x1x32xf32, #tpu.memory_space<vmem>>, vector<1x1x32xf32>
    %441 = vector.shape_cast %440 : vector<1x1x32xf32> to vector<1x32xf32>
    %442 = vector.broadcast %441 : vector<1x32xf32> to vector<8x32xf32>
    %443 = arith.mulf %439, %442 : vector<8x32xf32>
    %c1_365 = arith.constant 1 : index
    %c0_366 = arith.constant 0 : index
    %c0_367 = arith.constant 0 : index
    %444 = vector.load %arg17[%c1_365, %c0_366, %c0_367] : memref<2x1x32xf32, #tpu.memory_space<vmem>>, vector<1x1x32xf32>
    %445 = vector.shape_cast %444 : vector<1x1x32xf32> to vector<1x32xf32>
    %446 = vector.broadcast %445 : vector<1x32xf32> to vector<8x32xf32>
    %447 = arith.addf %443, %446 : vector<8x32xf32>
    %c0_368 = arith.constant 0 : index
    %c0_369 = arith.constant 0 : index
    %448 = vector.load %arg18[%c0_368, %c0_369] : memref<32x4xf32, #tpu.memory_space<vmem>>, vector<32x4xf32>
    %cst_370 = arith.constant dense<0.000000e+00> : vector<8x4xf32>
    %449 = tpu.matmul %447, %448, %cst_370 {dimension_numbers = #tpu.dot_dimension_numbers<[1], [0], [0], [1], [0, 0, 1, 1], [], []>} : vector<8x32xf32>, vector<32x4xf32>, vector<8x4xf32> -> vector<8x4xf32>
    %c0_371 = arith.constant 0 : index
    %c0_372 = arith.constant 0 : index
    %450 = vector.load %arg19[%c0_371, %c0_372] : memref<1x4xf32, #tpu.memory_space<vmem>>, vector<1x4xf32>
    %451 = vector.broadcast %450 : vector<1x4xf32> to vector<8x4xf32>
    %452 = arith.addf %449, %451 : vector<8x4xf32>
    %c0_373 = arith.constant 0 : index
    %c0_374 = arith.constant 0 : index
    %c0_375 = arith.constant 0 : index
    %453 = vector.load %arg20[%c0_373, %c0_374, %c0_375] : memref<1x8x4xf32, #tpu.memory_space<vmem>>, vector<1x8x4xf32>
    %454 = vector.shape_cast %453 : vector<1x8x4xf32> to vector<8x4xf32>
    %455 = vector.shape_cast %452 : vector<8x4xf32> to vector<1x8x4xf32>
    tpu.vector_store %arg20[%c0_373, %c0_374, %c0_375], %455 {strides = array<i32>} : memref<1x8x4xf32, #tpu.memory_space<vmem>>, vector<1x8x4xf32>,
    return
  }
  func.func @transform_0(%arg0: i32) -> (i32, i32, i32) {
    %c0_i32 = arith.constant 0 : i32
    %c0_i32_0 = arith.constant 0 : i32
    %c0_i32_1 = arith.constant 0 : i32
    return %arg0, %c0_i32, %c0_i32_0 : i32, i32, i32
  }
  func.func @transform_1(%arg0: i32) -> (i32, i32, i32, i32) {
    %c0_i32 = arith.constant 0 : i32
    %c0_i32_0 = arith.constant 0 : i32
    %c0_i32_1 = arith.constant 0 : i32
    %c0_i32_2 = arith.constant 0 : i32
    %c0_i32_3 = arith.constant 0 : i32
    return %c0_i32, %c0_i32_0, %c0_i32_1, %c0_i32_2 : i32, i32, i32, i32
  }
  func.func @transform_2(%arg0: i32) -> (i32, i32, i32, i32) {
    %c0_i32 = arith.constant 0 : i32
    %c0_i32_0 = arith.constant 0 : i32
    %c0_i32_1 = arith.constant 0 : i32
    %c0_i32_2 = arith.constant 0 : i32
    %c0_i32_3 = arith.constant 0 : i32
    return %c0_i32, %c0_i32_0, %c0_i32_1, %c0_i32_2 : i32, i32, i32, i32
  }
  func.func @transform_3(%arg0: i32) -> (i32, i32, i32, i32) {
    %c0_i32 = arith.constant 0 : i32
    %c0_i32_0 = arith.constant 0 : i32
    %c0_i32_1 = arith.constant 0 : i32
    %c0_i32_2 = arith.constant 0 : i32
    %c0_i32_3 = arith.constant 0 : i32
    return %c0_i32, %c0_i32_0, %c0_i32_1, %c0_i32_2 : i32, i32, i32, i32
  }
  func.func @transform_4(%arg0: i32) -> (i32, i32, i32, i32) {
    %c0_i32 = arith.constant 0 : i32
    %c0_i32_0 = arith.constant 0 : i32
    %c0_i32_1 = arith.constant 0 : i32
    %c0_i32_2 = arith.constant 0 : i32
    %c0_i32_3 = arith.constant 0 : i32
    return %c0_i32, %c0_i32_0, %c0_i32_1, %c0_i32_2 : i32, i32, i32, i32
  }
  func.func @transform_5(%arg0: i32) -> (i32, i32, i32, i32) {
    %c0_i32 = arith.constant 0 : i32
    %c0_i32_0 = arith.constant 0 : i32
    %c0_i32_1 = arith.constant 0 : i32
    %c0_i32_2 = arith.constant 0 : i32
    %c0_i32_3 = arith.constant 0 : i32
    return %c0_i32, %c0_i32_0, %c0_i32_1, %c0_i32_2 : i32, i32, i32, i32
  }
  func.func @transform_6(%arg0: i32) -> (i32, i32, i32, i32) {
    %c0_i32 = arith.constant 0 : i32
    %c0_i32_0 = arith.constant 0 : i32
    %c0_i32_1 = arith.constant 0 : i32
    %c0_i32_2 = arith.constant 0 : i32
    %c0_i32_3 = arith.constant 0 : i32
    return %c0_i32, %c0_i32_0, %c0_i32_1, %c0_i32_2 : i32, i32, i32, i32
  }
  func.func @transform_7(%arg0: i32) -> (i32, i32, i32, i32) {
    %c0_i32 = arith.constant 0 : i32
    %c0_i32_0 = arith.constant 0 : i32
    %c0_i32_1 = arith.constant 0 : i32
    %c0_i32_2 = arith.constant 0 : i32
    %c0_i32_3 = arith.constant 0 : i32
    return %c0_i32, %c0_i32_0, %c0_i32_1, %c0_i32_2 : i32, i32, i32, i32
  }
  func.func @transform_8(%arg0: i32) -> (i32, i32, i32) {
    %c0_i32 = arith.constant 0 : i32
    %c0_i32_0 = arith.constant 0 : i32
    %c0_i32_1 = arith.constant 0 : i32
    %c0_i32_2 = arith.constant 0 : i32
    return %c0_i32, %c0_i32_0, %c0_i32_1 : i32, i32, i32
  }
  func.func @transform_9(%arg0: i32) -> (i32, i32, i32) {
    %c0_i32 = arith.constant 0 : i32
    %c0_i32_0 = arith.constant 0 : i32
    %c0_i32_1 = arith.constant 0 : i32
    %c0_i32_2 = arith.constant 0 : i32
    return %c0_i32, %c0_i32_0, %c0_i32_1 : i32, i32, i32
  }
  func.func @transform_10(%arg0: i32) -> (i32, i32, i32) {
    %c0_i32 = arith.constant 0 : i32
    %c0_i32_0 = arith.constant 0 : i32
    %c0_i32_1 = arith.constant 0 : i32
    %c0_i32_2 = arith.constant 0 : i32
    return %c0_i32, %c0_i32_0, %c0_i32_1 : i32, i32, i32
  }
  func.func @transform_11(%arg0: i32) -> (i32, i32, i32) {
    %c0_i32 = arith.constant 0 : i32
    %c0_i32_0 = arith.constant 0 : i32
    %c0_i32_1 = arith.constant 0 : i32
    %c0_i32_2 = arith.constant 0 : i32
    return %c0_i32, %c0_i32_0, %c0_i32_1 : i32, i32, i32
  }
  func.func @transform_12(%arg0: i32) -> (i32, i32, i32) {
    %c0_i32 = arith.constant 0 : i32
    %c0_i32_0 = arith.constant 0 : i32
    %c0_i32_1 = arith.constant 0 : i32
    %c0_i32_2 = arith.constant 0 : i32
    return %c0_i32, %c0_i32_0, %c0_i32_1 : i32, i32, i32
  }
  func.func @transform_13(%arg0: i32) -> (i32, i32, i32) {
    %c0_i32 = arith.constant 0 : i32
    %c0_i32_0 = arith.constant 0 : i32
    %c0_i32_1 = arith.constant 0 : i32
    %c0_i32_2 = arith.constant 0 : i32
    return %c0_i32, %c0_i32_0, %c0_i32_1 : i32, i32, i32
  }
  func.func @transform_14(%arg0: i32) -> (i32, i32, i32) {
    %c0_i32 = arith.constant 0 : i32
    %c0_i32_0 = arith.constant 0 : i32
    %c0_i32_1 = arith.constant 0 : i32
    %c0_i32_2 = arith.constant 0 : i32
    return %c0_i32, %c0_i32_0, %c0_i32_1 : i32, i32, i32
  }
  func.func @transform_15(%arg0: i32) -> (i32, i32, i32) {
    %c0_i32 = arith.constant 0 : i32
    %c0_i32_0 = arith.constant 0 : i32
    %c0_i32_1 = arith.constant 0 : i32
    %c0_i32_2 = arith.constant 0 : i32
    return %c0_i32, %c0_i32_0, %c0_i32_1 : i32, i32, i32
  }
  func.func @transform_16(%arg0: i32) -> (i32, i32, i32) {
    %c0_i32 = arith.constant 0 : i32
    %c0_i32_0 = arith.constant 0 : i32
    %c0_i32_1 = arith.constant 0 : i32
    %c0_i32_2 = arith.constant 0 : i32
    return %c0_i32, %c0_i32_0, %c0_i32_1 : i32, i32, i32
  }
  func.func @transform_17(%arg0: i32) -> (i32, i32) {
    %c0_i32 = arith.constant 0 : i32
    %c0_i32_0 = arith.constant 0 : i32
    %c0_i32_1 = arith.constant 0 : i32
    return %c0_i32, %c0_i32_0 : i32, i32
  }
  func.func @transform_18(%arg0: i32) -> (i32, i32) {
    %c0_i32 = arith.constant 0 : i32
    %c0_i32_0 = arith.constant 0 : i32
    %c0_i32_1 = arith.constant 0 : i32
    return %c0_i32, %c0_i32_0 : i32, i32
  }
  func.func @transform_19(%arg0: i32) -> (i32, i32, i32) {
    %c0_i32 = arith.constant 0 : i32
    %c0_i32_0 = arith.constant 0 : i32
    %c0_i32_1 = arith.constant 0 : i32
    return %arg0, %c0_i32, %c0_i32_0 : i32, i32, i32
  }
}

</mosaic_0001>

<bundles_post_ra>
// kernel: tpu_custom_call.1
= control target key start
LH: loop header
LB: loop body
LE: loop exit
PB: predicated region body
PF: predicated region fallthrough
CT: control target
= control target key end

     0   :  { %s7128_s0 = inlined_call_operand.vmem [shape: f32[2,8,32], index: 0, kind: input, shape index: {}]   ;;  %s7129_s1 = inlined_call_operand.vmem [shape: f32[2,4,32,8], index: 1, kind: input, shape index: {}]   ;;  %s7130_s2 = inlined_call_operand.vmem [shape: f32[2,4,1,8], index: 2, kind: input, shape index: {}]   ;;  %s7131_s3 = inlined_call_operand.vmem [shape: f32[2,4,32,8], index: 3, kind: input, shape index: {}]   ;;  %s7132_s4 = inlined_call_operand.vmem [shape: f32[2,4,1,8], index: 4, kind: input, shape index: {}]   ;;  %s7133_s5 = inlined_call_operand.vmem [shape: f32[2,4,32,8], index: 5, kind: input, shape index: {}]   ;;  %s7134_s6 = inlined_call_operand.vmem [shape: f32[2,4,1,8], index: 6, kind: input, shape index: {}]   ;;  %s7135_s7 = inlined_call_operand.vmem [shape: f32[2,4,8,32], index: 7, kind: input, shape index: {}]   ;;  %s7136_s8 = inlined_call_operand.vmem [shape: f32[2,1,32], index: 8, kind: input, shape index: {}]   ;;  %s7137_s9 = inlined_call_operand.vmem [shape: f32[2,1,32], index: 9, kind: input, shape index: {}]   ;;  %s7138_s10 = inlined_call_operand.vmem [shape: f32[2,1,32], index: 10, kind: input, shape index: {}]   ;;  %s7139_s11 = inlined_call_operand.vmem [shape: f32[2,32,32], index: 11, kind: input, shape index: {}]   ;;  %s7140_s12 = inlined_call_operand.vmem [shape: f32[2,1,32], index: 12, kind: input, shape index: {}]   ;;  %s7141_s13 = inlined_call_operand.vmem [shape: f32[2,32,32], index: 13, kind: input, shape index: {}]   ;;  %s7142_s14 = inlined_call_operand.vmem [shape: f32[2,1,32], index: 14, kind: input, shape index: {}]   ;;  %s7143_s15 = inlined_call_operand.vmem [shape: f32[2,1,32], index: 15, kind: input, shape index: {}]   ;;  %s7144_s16 = inlined_call_operand.vmem [shape: f32[2,1,32], index: 16, kind: input, shape index: {}]   ;;  %s7145_s17 = inlined_call_operand.vmem [shape: f32[32,4], index: 17, kind: input, shape index: {}]   ;;  %s7146_s18 = inlined_call_operand.vmem [shape: f32[1,4], index: 18, kind: input, shape index: {}]   ;;  %s7147_s19 = inlined_call_operand.vmem [shape: f32[2,8,4], index: 19, kind: output, shape index: {}]  }
   0x1   :  { %7152 = sst [smem:[#allocation2_spill]] %s7128_s0  ;;  %s6303_s0 = smov 0  }
   0x2   :  { %7153 = sst [smem:[#allocation3_spill]] %s7129_s1 }
   0x3   :  { %7154 = sst [smem:[#allocation4_spill]] %s7130_s2 }
   0x4   :  { %7155 = sst [smem:[#allocation5_spill]] %s7131_s3 }
   0x5 LB: > { %s5099_s30 = sadd.s32 4294967295, %s6198_s0   ;;  %p5103_p0 = scmp.ge.s32.totalorder %s6198_s0, 1  ;;  %s6198_s0 = sphi %s6303_s0, %s29_s0  }
   0x6   : > { %p536_p1 = scmp.lt.s32.totalorder %s6198_s0, 3 }
   0x8   : > { %p537_p2 = pnand %p5103_p0, %p536_p1 }
   0x9   : > { %s7156_s1 = sld [smem:[#allocation5_spill]] (!%p537_p2)  ;;  %s7157_s25 = sld [smem:[#allocation3_spill]] (!%p537_p2)  ;;  %v6200_v3 = vmov (!%p537_p2), 0.0|0.0   ;;  %vm6201_vm0 = vmmov (!%p537_p2), 0   ;;  %v6202_v11 = vmov (!%p537_p2), 0.0   ;;  %vm610_vm1 = vcmask (!%p537_p2), 261120  }
   0xa   : > { %540 = sbr.rel (%p537_p2) target bundleno = 10057 (0x2749), region = 96  ;;  %5973 = vmatprep.subr.bf16.mxu1 (!%p537_p2), %v6200_v3  ;;  %5967 = vmatprep.subr.bf16.mxu0 (!%p537_p2), %v6200_v3  ;;  %p590_p3 = scmp.lt.s32.totalorder (!%p537_p2), %s5099_s30, 1  ;;  %v5108_v15 = vld [vmem:[%s7132_s4] ss:$0 sm:$0xff] (!%p537_p2)  ;;  %vm846_vm2 = vcmask (!%p537_p2), 64512   ;;  %v766_v24 = vld [vmem:[%s7133_s5 + $0x8] sm:$0xff] (!%p537_p2) }
   0xb   : > { %5547 = vmatprep.mubr.msk.f32.mxu1 (!%p537_p2), %vm6201_vm0, %v6202_v11  ;;  %5536 = vmatprep.mubr.msk.f32.mxu0 (!%p537_p2), %vm6201_vm0, %v6202_v11  ;;  %s7158_s27 = sld [smem:[#allocation2_spill]] (!%p537_p2)  ;;  %s7159_s2 = sld [smem:[#allocation4_spill]] (!%p537_p2)  ;;  %v765_v23 = vld [vmem:[%s7133_s5] sm:$0xff] (!%p537_p2)  ;;  %v767_v25 = vld [vmem:[%s7133_s5 + $0x10] sm:$0xff] (!%p537_p2)  ;;  %v768_v27 = vld [vmem:[%s7133_s5 + $0x18] sm:$0xff] (!%p537_p2)  ;;  %vm5044_vm3 = vcmask (!%p537_p2), 31744  }
   0xc   : > { %v5980_v26 = vpack.c.bf16 (!%p537_p2), %v766_v24, %v765_v23  ;;  %v5983_v28 = vpack.c.bf16 (!%p537_p2), %v768_v27, %v767_v25  ;;  %v5110_v38 = vld [vmem:[%s7134_s6] ss:$0 sm:$0xff] (!%p537_p2)  ;;  %v5127_v60 = vld [vmem:[%s7132_s4 + $0x1] ss:$0 sm:$0xff] (!%p537_p2) }
   0xf   : > { %v684_v0 = vld [vmem:[%s7156_s1] sm:$0xff] (!%p537_p2)  ;;  %v685_v1 = vld [vmem:[%s7156_s1 + $0x8] sm:$0xff] (!%p537_p2)  ;;  %v686_v6 = vld [vmem:[%s7156_s1 + $0x10] sm:$0xff] (!%p537_p2) }
  0x10   : > { %v599_v2 = vld [vmem:[%s7157_s25] sm:$0xff] (!%p537_p2)  ;;  %v5974_v4 = vpack.c.bf16 (!%p537_p2), %v685_v1, %v684_v0  ;;  %v600_v5 = vld [vmem:[%s7157_s25 + $0x8] sm:$0xff] (!%p537_p2)  ;;  %v687_v7 = vld [vmem:[%s7156_s1 + $0x18] sm:$0xff] (!%p537_p2) }
  0x11   : > { %v5968_v8 = vpack.c.bf16 %v600_v5, %v599_v2  ;;  %v601_v9 = vld [vmem:[%s7157_s25 + $0x10] sm:$0xff]  ;;  %v602_v10 = vld [vmem:[%s7157_s25 + $0x18] sm:$0xff]  ;;  %v5977_v12 = vpack.c.bf16 %v687_v7, %v686_v6  ;;  %s7162_s30 = smov (!%p590_p3, %s5099_s30), 1  ;;  %v5106_v16 = vld [vmem:[%s7159_s2] ss:$0 sm:$0xff] }
  0x12   : > { %5975 = vmatpush3.bf16.msra.mxu1 %v5974_v4  ;;  %v5971_v13 = vpack.c.bf16 %v602_v10, %v601_v9  ;;  %s7151_s24 = sshll.u32 %s7162_s30, 3  ;;  %v5115_v41 = vld [vmem:[%s7157_s25 + $0x20] sm:$0xff]  ;;  %v5116_v42 = vld [vmem:[%s7157_s25 + $0x28] sm:$0xff]  ;;  %v5117_v44 = vld [vmem:[%s7157_s25 + $0x30] sm:$0xff]  ;;  %s7160_s26 = sshll.u32 %s7162_s30, 3 }
  0x13   : > { %5969 = vmatpush3.bf16.msra.mxu0 %v5968_v8  ;;  %5976 = vmatprep.subr.bf16.mxu1 %v6200_v3  ;;  %s593_s28 = scalar_lea.vmem %s7158_s27, %s7151_s24  ;;  %v5986_v43 = vpack.c.bf16 %v5116_v42, %v5115_v41  ;;  %v5118_v45 = vld [vmem:[%s7157_s25 + $0x38] sm:$0xff]  ;;  %v5122_v48 = vld [vmem:[%s7156_s1 + $0x20] sm:$0xff]  ;;  %v5123_v49 = vld [vmem:[%s7156_s1 + $0x28] sm:$0xff]  ;;  %s597_s29 = scalar_lea.vmem %s7147_s19, %s7160_s26 }
  0x14   : > { %5970 = vmatprep.subr.bf16.mxu0 %v6200_v3  ;;  %v6351_v14 = vld [vmem:[%s593_s28] sm:$0xff]  ;;  %v5989_v46 = vpack.c.bf16 %v5118_v45, %v5117_v44  ;;  %v5992_v51 = vpack.c.bf16 %v5123_v49, %v5122_v48  ;;  %v5124_v53 = vld [vmem:[%s7156_s1 + $0x30] sm:$0xff]  ;;  %v5125_v54 = vld [vmem:[%s7156_s1 + $0x38] sm:$0xff] }
  0x15   : > { %v5995_v55 = vpack.c.bf16 %v5125_v54, %v5124_v53  ;;  %v5120_v61 = vld [vmem:[%s7159_s2 + $0x1] ss:$0 sm:$0xff]  ;;  %v5130_v4 = vld [vmem:[%s7133_s5 + $0x28] sm:$0xff]  ;;  %v5131_v5 = vld [vmem:[%s7133_s5 + $0x30] sm:$0xff] }
  0x16   : > { %5978 = vmatpush3.bf16.msra.mxu1 %v5977_v12  ;;  %v5129_v2 = vld [vmem:[%s7133_s5 + $0x20] sm:$0xff]  ;;  %v5132_v7 = vld [vmem:[%s7133_s5 + $0x38] sm:$0xff] }
  0x17   : > { %5972 = vmatpush3.bf16.msra.mxu0 %v5971_v13  ;;  %5561 = vmatprep.subr.mxu1 %v6202_v11  ;;  %v5998_v6 = vpack.c.bf16 %v5130_v4, %v5129_v2  ;;  %v6001_v8 = vpack.c.bf16 %v5132_v7, %v5131_v5  ;;  %v5142_v27 = vld [vmem:[%s7157_s25 + $0x40] sm:$0xff] }
  0x18   : > { %5979 = vmatprep.subr.bf16.mxu0 %v6200_v3  ;;  %v5154_v49 = vld [vmem:[%s7132_s4 + $0x2] ss:$0 sm:$0xff] }
  0x19   : > { %5548 = vmatmul.mubr.msk.f32.vlgmr.msra.gmra.mrb[0].mxu1 %vm610_vm1, %v6351_v14  ;;  %v5161_v7 = vld [vmem:[%s7134_s6 + $0x2] ss:$0 sm:$0xff] }
  0x1a   : > { %5537 = vmatmul.mubr.msk.f32.vlgmr.msra.gmra.mrb[0].mxu0 %vm610_vm1, %v6351_v14  ;;  %5563 = vmatprep.mubr.msk.f32.mxu1 %vm6201_vm0, %v6202_v11 }
  0x1b   : > { %5558 = vmatprep.mubr.msk.f32.mxu0 %vm6201_vm0, %v6202_v11  ;;  %5981 = vmatpush3.bf16.msra.mxu0 %v5980_v26  ;;  %v5139_v26 = vld [vmem:[%s7135_s7 + $0x8] sm:$0xff] }
  0x1c   : > { %5982 = vmatprep.subr.bf16.mxu0 %v6200_v3 }
  0x1f   : > { %5984 = vmatpush3.bf16.msra.mxu0 %v5983_v28  ;;  %v5143_v28 = vld [vmem:[%s7157_s25 + $0x48] sm:$0xff] }
  0x20   : > { %5985 = vmatprep.subr.bf16.mxu0 %v6200_v3 }
  0x22   : > { %5559 = vmatmul.mubr.msk.f32.vlgmr.msra.gmra.mrb[2].mxu0 %vm610_vm1, %v6351_v14 }
  0x23   : > { %5579 = vmatprep.mubr.msk.f32.mxu0 %vm6201_vm0, %v6202_v11  ;;  %5987 = vmatpush3.bf16.msra.mxu0 %v5986_v43 }
  0x24   : > { %5988 = vmatprep.subr.bf16.mxu0 %v6200_v3 }
  0x27   : > { %5990 = vmatpush3.bf16.msra.mxu0 %v5989_v46 }
  0x28   : > { %5997 = vmatprep.subr.bf16.mxu0 %v6200_v3 }
  0x2a   : > { %5580 = vmatmul.mubr.msk.f32.vlgmr.msra.gmra.mrb[4].mxu0 %vm610_vm1, %v6351_v14 }
  0x2b   : > { %5601 = vmatprep.mubr.msk.f32.mxu0 %vm6201_vm0, %v6202_v11  ;;  %5999 = vmatpush3.bf16.msra.mxu0 %v5998_v6 }
  0x2c   : > { %6000 = vmatprep.subr.bf16.mxu0 %v6200_v3 }
  0x2f   : > { %6002 = vmatpush3.bf16.msra.mxu0 %v6001_v8 }
  0x30   : > { %6003 = vmatprep.subr.bf16.mxu0 %v6200_v3 }
  0x32   : > { %5602 = vmatmul.mubr.msk.f32.vlgmr.msra.gmra.mrb[6].mxu0 %vm610_vm1, %v6351_v14 }
  0x33   : > { %5632 = vmatprep.mubr.msk.f32.mxu0 %vm6201_vm0, %v6202_v11 }
  0xec   : > { %v761_v17 = vpop.f32.mrb[0].mxu1 }
  0xed   : > { %v762_v18 = vadd.f32 %v5108_v15, %v761_v17  ;;  %v5549_v19 = vpop.f32.mrb[1].mxu1  ;;  %v680_v20 = vpop.f32.mrb[0].mxu0 }
  0xee   : > { %v681_v21 = vadd.f32 %v5106_v16, %v680_v20  ;;  %v5538_v22 = vpop.f32.mrb[1].mxu0  ;;  %v5134_v20 = vld [vmem:[%s7134_s6 + $0x1] ss:$0 sm:$0xff] }
  0xef   : > { %5562 = vmatpush3.xpose.msk.msra.mxu1 %vm846_vm2, %v762_v18 }
  0xf0   : > { %5566 = vmatprep.subr.mxu1 %v6202_v11 }
  0xf2   : > { %5564 = vmatmul.mubr.msk.f32.vlgmr.msra.gmra.mrb[2].mxu1 %vm846_vm2, %v681_v21 }
  0xf3   : > { %5568 = vmatprep.mubr.msk.f32.mxu1 %vm6201_vm0, %v6202_v11 }
  0xf5   : > { %v842_v37 = vpop.f32.mrb[2].mxu0 }
  0xf6   : > { %v5560_v39 = vpop.f32.mrb[3].mxu0  ;;  %v843_v40 = vadd.f32 %v5110_v38, %v842_v37 }
  0xf7   : > { %v5151_v39 = vld [vmem:[%s7156_s1 + $0x50] sm:$0xff] }
  0xf8   : > { %5567 = vmatpush3.msra.mxu1 %v843_v40  ;;  %v5152_v40 = vld [vmem:[%s7156_s1 + $0x58] sm:$0xff] }
  0xf9   : > { %5991 = vmatprep.subr.bf16.mxu1 %v6200_v3  ;;  %v6013_v41 = vpack.c.bf16 %v5152_v40, %v5151_v39 }
  0xfd   : > { %v1087_v56 = vpop.f32.mrb[4].mxu0 }
  0xfe   : > { %v5581_v57 = vpop.f32.mrb[5].mxu0  ;;  %v1088_v1 = vadd.f32 %v5120_v61, %v1087_v56  ;;  %v5157_v56 = vld [vmem:[%s7133_s5 + $0x48] sm:$0xff] }
  0xff   : > { %v5158_v57 = vld [vmem:[%s7133_s5 + $0x50] sm:$0xff] }
 0x105   : > { %v1253_v19 = vpop.f32.mrb[6].mxu0 }
 0x106   : > { %v5603_v21 = vpop.f32.mrb[7].mxu0  ;;  %v1254_v22 = vadd.f32 %v5134_v20, %v1253_v19  ;;  %v5170_v19 = vld [vmem:[%s7157_s25 + $0x70] sm:$0xff]  ;;  %v5171_v20 = vld [vmem:[%s7157_s25 + $0x78] sm:$0xff] }
 0x107   : > { %v6025_v21 = vpack.c.bf16 %v5171_v20, %v5170_v19  ;;  %v2577_v19 = vld [vmem:[%s7139_s11 + $0x18] sm:$0xff] }
 0x1c5   : > { %v919_v29 = vpop.f32.mrb[2].mxu1 }
 0x1c6   : > { %v5565_v30 = vpop.f32.mrb[3].mxu1  ;;  %v923_v31 = vsel %vm846_vm2, %v919_v29, -inf }
 0x1c7   : > { %924 = vmax.xlane.f32.xlu0 %v923_v31  ;;  %v5144_v30 = vld [vmem:[%s7157_s25 + $0x50] sm:$0xff]  ;;  %v5145_v31 = vld [vmem:[%s7157_s25 + $0x58] sm:$0xff] }
 0x254   : > { %v925_v32 = vpop.xlane.xlu0 %924 }
 0x255   : > { %v926_v33 = vsub.f32 %v919_v29, %v925_v32  ;;  %v6004_v29 = vpack.c.bf16 %v5143_v28, %v5142_v27  ;;  %v6007_v32 = vpack.c.bf16 %v5145_v31, %v5144_v30 }
 0x257   : > { %v927_v34 = vmul.f32 1.442695, %v926_v33  ;;  %6005 = vmatpush3.bf16.msra.mxu0 %v6004_v29  ;;  %v1007_v33 = vld [vmem:[%s7135_s7] sm:$0xff] }
 0x258   : > { %6006 = vmatprep.subr.bf16.mxu0 %v6200_v3 }
 0x259   : > { %6152 = vpow2.f32 %v927_v34  ;;  %v5149_v34 = vld [vmem:[%s7156_s1 + $0x40] sm:$0xff] }
 0x25b   : > { %6008 = vmatpush3.bf16.msra.mxu0 %v6007_v32 }
 0x25c   : > { %6015 = vmatprep.subr.bf16.mxu0 %v6200_v3 }
 0x25e   : > { %5633 = vmatmul.mubr.msk.f32.vlgmr.msra.gmra.mrb[8].mxu0 %vm610_vm1, %v6351_v14 }
 0x25f   : > { %5654 = vmatprep.mubr.msk.f32.mxu0 %vm6201_vm0, %v6202_v11 }
 0x263   : > { %v6153_v35 = vpop.eup %6152 }
 0x264   : > { %v929_v36 = vsel %vm846_vm2, %v6153_v35, 0.0 }
 0x265   : > { %930 = vadd.xlane.f32.xlu0 %v929_v36 }
 0x2f2   : > { %v931_v47 = vpop.xlane.xlu0 %930 }
 0x2f3   : > { %6154 = vrcp.f32 %v931_v47 }
 0x2fd   : > { %v6155_v50 = vpop.eup %6154 }
 0x2fe   : > { %v933_v52 = vmul.f32 %v6155_v50, %v6153_v35  ;;  %v5150_v35 = vld [vmem:[%s7156_s1 + $0x48] sm:$0xff]  ;;  %v5147_v50 = vld [vmem:[%s7159_s2 + $0x2] ss:$0 sm:$0xff] }
 0x2ff   : > { %v6010_v38 = vpack.c.bf16 %v5150_v35, %v5149_v34  ;;  %v5180_v35 = vld [vmem:[%s7132_s4 + $0x3] ss:$0 sm:$0xff] }
 0x300   : > { %5569 = vmatmul.mubr.msk.f32.vlgmr.msra.gmra.mrb[4].mxu1 %vm846_vm2, %v933_v52 }
 0x301   : > { %5993 = vmatpush3.bf16.msra.mxu1 %v5992_v51  ;;  %5590 = vmatprep.mubr.msk.f32.mxu1 %vm6201_vm0, %v6202_v11 }
 0x302   : > { %5994 = vmatprep.subr.bf16.mxu1 %v6200_v3 }
 0x305   : > { %5996 = vmatpush3.bf16.msra.mxu1 %v5995_v55  ;;  %v5156_v55 = vld [vmem:[%s7133_s5 + $0x40] sm:$0xff] }
 0x306   : > { %5604 = vmatprep.subr.mxu1 %v6202_v11 }
 0x308   : > { %5591 = vmatmul.mubr.msk.f32.vlgmr.msra.gmra.mrb[6].mxu1 %vm610_vm1, %v6351_v14 }
 0x309   : > { %5606 = vmatprep.mubr.msk.f32.mxu1 %vm6201_vm0, %v6202_v11 }
 0x331   : > { %v1644_v42 = vpop.f32.mrb[8].mxu0 }
 0x332   : > { %v5634_v43 = vpop.f32.mrb[9].mxu0  ;;  %v1645_v54 = vadd.f32 %v5147_v50, %v1644_v42  ;;  %v5183_v42 = vld [vmem:[%s7133_s5 + $0x68] sm:$0xff] }
 0x333   : > { %v5184_v43 = vld [vmem:[%s7133_s5 + $0x70] sm:$0xff] }
 0x3d3   : > { %v6437_v58 = vpop.f32.mrb[4].mxu1 }
 0x3d4   : > { %v5570_v59 = vpop.f32.mrb[5].mxu1 }
 0x3d5   : > { %v5159_v59 = vld [vmem:[%s7133_s5 + $0x58] sm:$0xff] }
 0x3db   : > { %v1170_v62 = vpop.f32.mrb[6].mxu1 }
 0x3dc   : > { %v1171_v63 = vadd.f32 %v5127_v60, %v1170_v62  ;;  %v5592_v0 = vpop.f32.mrb[7].mxu1  ;;  %v6019_v60 = vpack.c.bf16 %v5159_v59, %v5158_v57  ;;  %v5192_v59 = vld [vmem:[%s7135_s7 + $0x18] sm:$0xff] }
 0x3de   : > { %5605 = vmatpush3.xpose.msk.msra.mxu1 %vm846_vm2, %v1171_v63 }
 0x3df   : > { %5609 = vmatprep.subr.mxu1 %v6202_v11 }
 0x3e1   : > { %5607 = vmatmul.mubr.msk.f32.vlgmr.msra.gmra.mrb[8].mxu1 %vm846_vm2, %v1088_v1 }
 0x3e2   : > { %5611 = vmatprep.mubr.msk.f32.mxu1 %vm6201_vm0, %v6202_v11  ;;  %5610 = vmatpush3.msra.mxu1 %v1254_v22  ;;  %v5175_v22 = vld [vmem:[%s7156_s1 + $0x60] sm:$0xff] }
 0x3e3   : > { %5614 = vmatprep.subr.mxu1 %v6202_v11 }
 0x4b4   : > { %v1329_v9 = vpop.f32.mrb[8].mxu1 }
 0x4b5   : > { %v5608_v10 = vpop.f32.mrb[9].mxu1  ;;  %v1333_v12 = vsel %vm846_vm2, %v1329_v9, -inf }
 0x4b6   : > { %1334 = vmax.xlane.f32.xlu1 %v1333_v12  ;;  %v5166_v10 = vld [vmem:[%s7135_s7 + $0x10] sm:$0xff] }
 0x543   : > { %v1335_v13 = vpop.xlane.xlu1 %1334 }
 0x544   : > { %v1336_v15 = vsub.f32 %v1329_v9, %v1335_v13 }
 0x546   : > { %v1337_v16 = vmul.f32 1.442695, %v1336_v15 }
 0x548   : > { %6156 = vpow2.f32 %v1337_v16  ;;  %v5168_v16 = vld [vmem:[%s7157_s25 + $0x60] sm:$0xff] }
 0x552   : > { %v6157_v17 = vpop.eup %6156 }
 0x553   : > { %v1339_v18 = vsel %vm846_vm2, %v6157_v17, 0.0 }
 0x554   : > { %1340 = vadd.xlane.f32.xlu1 %v1339_v18 }
 0x5e1   : > { %v1341_v23 = vpop.xlane.xlu1 %1340 }
 0x5e2   : > { %6158 = vrcp.f32 %v1341_v23  ;;  %v5176_v23 = vld [vmem:[%s7156_s1 + $0x68] sm:$0xff] }
 0x5ec   : > { %v6159_v24 = vpop.eup %6158 }
 0x5ed   : > { %v1343_v25 = vmul.f32 %v6159_v24, %v6157_v17  ;;  %v5169_v17 = vld [vmem:[%s7157_s25 + $0x68] sm:$0xff]  ;;  %v6028_v24 = vpack.c.bf16 %v5176_v23, %v5175_v22 }
 0x5ee   : > { %v6022_v18 = vpack.c.bf16 %v5169_v17, %v5168_v16  ;;  %v2574_v16 = vld [vmem:[%s7139_s11] sm:$0xff]  ;;  %v2575_v17 = vld [vmem:[%s7139_s11 + $0x8] sm:$0xff] }
 0x5ef   : > { %5612 = vmatmul.mubr.msk.f32.vlgmr.msra.gmra.mrb[10].mxu1 %vm846_vm2, %v1343_v25  ;;  %v5177_v25 = vld [vmem:[%s7156_s1 + $0x70] sm:$0xff]  ;;  %v2660_v22 = vld [vmem:[%s7141_s13 + $0x8] sm:$0xff] }
 0x5f0   : > { %5615 = vmatpush3.msra.mxu1 %v5139_v26  ;;  %5616 = vmatprep.mubr.msk.f32.mxu1 %vm6201_vm0, %v6202_v11  ;;  %v5178_v26 = vld [vmem:[%s7156_s1 + $0x78] sm:$0xff] }
 0x5f1   : > { %5619 = vmatprep.subr.mxu1 %v6202_v11  ;;  %v6031_v29 = vpack.c.bf16 %v5178_v26, %v5177_v25 }
 0x6c2   : > { %v1413_v36 = vpop.f32.mrb[10].mxu1 }
 0x6c3   : > { %v5613_v37 = vpop.f32.mrb[11].mxu1  ;;  %5617 = vmatmul.mubr.msk.f32.vlgmr.msra.gmra.mrb[12].mxu1 %vm846_vm2, %v1413_v36  ;;  %v5173_v36 = vld [vmem:[%s7159_s2 + $0x3] ss:$0 sm:$0xff] }
 0x6c4   : > { %5620 = vmatpush3.msra.mxu1 %v1007_v33  ;;  %5621 = vmatprep.mubr.msk.f32.mxu1 %vm6201_vm0, %v6202_v11 }
 0x6c5   : > { %6009 = vmatprep.subr.bf16.mxu1 %v6200_v3 }
 0x6c7   : > { %5622 = vmatmul.mubr.msk.f32.vlgmr.msra.gmra.mrb[14].mxu1 %vm846_vm2, %v6437_v58  ;;  %v6016_v58 = vpack.c.bf16 %v5157_v56, %v5156_v55  ;;  %v5187_v56 = vld [vmem:[%s7134_s6 + $0x3] ss:$0 sm:$0xff] }
 0x6c8   : > { %6011 = vmatpush3.bf16.msra.mxu1 %v6010_v38  ;;  %5643 = vmatprep.mubr.msk.f32.mxu1 %vm6201_vm0, %v6202_v11 }
 0x6c9   : > { %6012 = vmatprep.subr.bf16.mxu1 %v6200_v3  ;;  %6017 = vmatpush3.bf16.msra.mxu0 %v6016_v58 }
 0x6ca   : > { %6018 = vmatprep.subr.bf16.mxu0 %v6200_v3 }
 0x6cc   : > { %6014 = vmatpush3.bf16.msra.mxu1 %v6013_v41  ;;  %v5182_v41 = vld [vmem:[%s7133_s5 + $0x60] sm:$0xff] }
 0x6cd   : > { %5657 = vmatprep.subr.mxu1 %v6202_v11  ;;  %6020 = vmatpush3.bf16.msra.mxu0 %v6019_v60 }
 0x6ce   : > { %5667 = vmatprep.subr.mxu0 %v6202_v11 }
 0x6cf   : > { %5644 = vmatmul.mubr.msk.f32.vlgmr.msra.gmra.mrb[16].mxu1 %vm610_vm1, %v6351_v14 }
 0x6d0   : > { %5659 = vmatprep.mubr.msk.f32.mxu1 %vm6201_vm0, %v6202_v11  ;;  %5655 = vmatmul.mubr.msk.f32.vlgmr.msra.gmra.mrb[10].mxu0 %vm610_vm1, %v6351_v14 }
 0x6d1   : > { %5669 = vmatprep.mubr.msk.f32.mxu0 %vm6201_vm0, %v6202_v11  ;;  %5668 = vmatpush3.msra.mxu0 %v5166_v10 }
 0x6d2   : > { %6027 = vmatprep.subr.bf16.mxu0 %v6200_v3 }
 0x796   : > { %v1488_v44 = vpop.f32.mrb[12].mxu1 }
 0x797   : > { %v5618_v45 = vpop.f32.mrb[13].mxu1 }
 0x798   : > { %v5185_v45 = vld [vmem:[%s7133_s5 + $0x78] sm:$0xff] }
 0x79a   : > { %v1561_v46 = vpop.f32.mrb[14].mxu1 }
 0x79b   : > { %v6528_v47 = vadd.f32 %v1561_v46, %v1488_v44  ;;  %v5623_v48 = vpop.f32.mrb[15].mxu1  ;;  %v6034_v44 = vpack.c.bf16 %v5183_v42, %v5182_v41  ;;  %v6037_v46 = vpack.c.bf16 %v5185_v45, %v5184_v43  ;;  %v5199_v41 = vld [vmem:[%s7142_s14] ss:$0 sm:$0xff] }
 0x7a2   : > { %v1727_v51 = vpop.f32.mrb[16].mxu1 }
 0x7a3   : > { %v1728_v52 = vadd.f32 %v5154_v49, %v1727_v51  ;;  %v5645_v53 = vpop.f32.mrb[17].mxu1  ;;  %v1810_v6 = vpop.f32.mrb[10].mxu0 }
 0x7a4   : > { %v5656_v8 = vpop.f32.mrb[11].mxu0  ;;  %v1811_v9 = vadd.f32 %v5161_v7, %v1810_v6 }
 0x7a5   : > { %5658 = vmatpush3.xpose.msk.msra.mxu1 %vm846_vm2, %v1728_v52 }
 0x7a6   : > { %5662 = vmatprep.subr.mxu1 %v6202_v11 }
 0x7a8   : > { %5660 = vmatmul.mubr.msk.f32.vlgmr.msra.gmra.mrb[18].mxu1 %vm846_vm2, %v1645_v54 }
 0x7a9   : > { %5664 = vmatprep.mubr.msk.f32.mxu1 %vm6201_vm0, %v6202_v11  ;;  %5663 = vmatpush3.msra.mxu1 %v1811_v9 }
 0x7aa   : > { %6021 = vmatprep.subr.bf16.mxu1 %v6200_v3 }
 0x87b   : > { %v1886_v61 = vpop.f32.mrb[18].mxu1 }
 0x87c   : > { %v5661_v62 = vpop.f32.mrb[19].mxu1  ;;  %v1890_v63 = vsel %vm846_vm2, %v1886_v61, -inf }
 0x87d   : > { %1891 = vmax.xlane.f32.xlu0 %v1890_v63 }
 0x90a   : > { %v1892_v0 = vpop.xlane.xlu0 %1891 }
 0x90b   : > { %v1893_v1 = vsub.f32 %v1886_v61, %v1892_v0 }
 0x90d   : > { %v1894_v2 = vmul.f32 1.442695, %v1893_v1 }
 0x90f   : > { %6160 = vpow2.f32 %v1894_v2  ;;  %v5194_v2 = vld [vmem:[%s7136_s8] ss:$0 sm:$0xff] }
 0x919   : > { %v6161_v4 = vpop.eup %6160 }
 0x91a   : > { %v1896_v5 = vsel %vm846_vm2, %v6161_v4, 0.0 }
 0x91b   : > { %1897 = vadd.xlane.f32.xlu1 %v1896_v5 }
 0x9a8   : > { %v1898_v12 = vpop.xlane.xlu1 %1897 }
 0x9a9   : > { %6162 = vrcp.f32 %v1898_v12 }
 0x9b3   : > { %v6163_v13 = vpop.eup %6162 }
 0x9b4   : > { %v1900_v15 = vmul.f32 %v6163_v13, %v6161_v4 }
 0x9b6   : > { %5665 = vmatmul.mubr.msk.f32.vlgmr.msra.gmra.mrb[20].mxu1 %vm846_vm2, %v1900_v15 }
 0x9b7   : > { %5680 = vmatprep.mubr.msk.f32.mxu1 %vm6201_vm0, %v6202_v11  ;;  %6023 = vmatpush3.bf16.msra.mxu1 %v6022_v18  ;;  %v6040_v18 = vpack.c.bf16 %v2575_v17, %v2574_v16  ;;  %v5220_v16 = vld [vmem:[%s7133_s5 + $0x98] sm:$0xff] }
 0x9b8   : > { %6024 = vmatprep.subr.bf16.mxu1 %v6200_v3 }
 0x9bb   : > { %6026 = vmatpush3.bf16.msra.mxu1 %v6025_v21  ;;  %v2659_v21 = vld [vmem:[%s7141_s13] sm:$0xff] }
 0x9bc   : > { %6033 = vmatprep.subr.bf16.mxu1 %v6200_v3  ;;  %v6046_v23 = vpack.c.bf16 %v2660_v22, %v2659_v21  ;;  %v5231_v21 = vld [vmem:[%s7157_s25 + $0xb8] sm:$0xff] }
 0x9be   : > { %5681 = vmatmul.mubr.msk.f32.vlgmr.msra.gmra.mrb[22].mxu1 %vm610_vm1, %v6351_v14 }
 0x9bf   : > { %5702 = vmatprep.mubr.msk.f32.mxu1 %vm6201_vm0, %v6202_v11  ;;  %6035 = vmatpush3.bf16.msra.mxu1 %v6034_v44 }
 0x9c0   : > { %6036 = vmatprep.subr.bf16.mxu1 %v6200_v3 }
 0x9c3   : > { %6038 = vmatpush3.bf16.msra.mxu1 %v6037_v46 }
 0x9c4   : > { %5715 = vmatprep.subr.mxu1 %v6202_v11 }
 0x9c6   : > { %5703 = vmatmul.mubr.msk.f32.vlgmr.msra.gmra.mrb[24].mxu1 %vm610_vm1, %v6351_v14 }
 0x9c7   : > { %5717 = vmatprep.mubr.msk.f32.mxu1 %vm6201_vm0, %v6202_v11  ;;  %5716 = vmatpush3.msra.mxu1 %v5192_v59  ;;  %v5206_v59 = vld [vmem:[%s7157_s25 + $0x98] sm:$0xff] }
 0x9c8   : > { %6045 = vmatprep.subr.bf16.mxu1 %v6200_v3 }
 0xa89   : > { %v1970_v27 = vpop.f32.mrb[20].mxu1 }
 0xa8a   : > { %v5666_v28 = vpop.f32.mrb[21].mxu1  ;;  %5670 = vmatmul.mubr.msk.f32.vlgmr.msra.gmra.mrb[12].mxu0 %vm846_vm2, %v1970_v27 }
 0xa8b   : > { %6029 = vmatpush3.bf16.msra.mxu0 %v6028_v24  ;;  %5691 = vmatprep.mubr.msk.f32.mxu0 %vm6201_vm0, %v6202_v11  ;;  %v5195_v28 = vld [vmem:[%s7137_s9] ss:$0 sm:$0xff] }
 0xa8c   : > { %6030 = vmatprep.subr.bf16.mxu0 %v6200_v3 }
 0xa8f   : > { %6032 = vmatpush3.bf16.msra.mxu0 %v6031_v29 }
 0xa90   : > { %5705 = vmatprep.subr.mxu0 %v6202_v11 }
 0xa91   : > { %v2129_v30 = vpop.f32.mrb[22].mxu1 }
 0xa92   : > { %5692 = vmatmul.mubr.msk.f32.vlgmr.msra.gmra.mrb[14].mxu0 %vm610_vm1, %v6351_v14  ;;  %v5682_v31 = vpop.f32.mrb[23].mxu1  ;;  %v2130_v40 = vadd.f32 %v5173_v36, %v2129_v30  ;;  %v5196_v30 = vld [vmem:[%s7138_s10] ss:$0 sm:$0xff] }
 0xa93   : > { %5707 = vmatprep.mubr.msk.f32.mxu0 %vm6201_vm0, %v6202_v11  ;;  %v5197_v36 = vld [vmem:[%s7140_s12] ss:$0 sm:$0xff] }
 0xa99   : > { %v2295_v55 = vpop.f32.mrb[24].mxu1 }
 0xa9a   : > { %v5704_v57 = vpop.f32.mrb[25].mxu1  ;;  %v2296_v58 = vadd.f32 %v5187_v56, %v2295_v55  ;;  %v5210_v55 = vld [vmem:[%s7156_s1 + $0x80] sm:$0xff]  ;;  %v5211_v56 = vld [vmem:[%s7156_s1 + $0x88] sm:$0xff] }
 0xa9b   : > { %v6058_v57 = vpack.c.bf16 %v5211_v56, %v5210_v55  ;;  %v5236_v55 = vld [vmem:[%s7156_s1 + $0xa8] sm:$0xff] }
 0xb5d   : > { %v2045_v32 = vpop.f32.mrb[12].mxu0 }
 0xb5e   : > { %v2049_v33 = vadd.f32 %v2045_v32, %v6528_v47  ;;  %v5671_v34 = vpop.f32.mrb[13].mxu0 }
 0xb5f   : > { %v2662_v34 = vld [vmem:[%s7141_s13 + $0x18] sm:$0xff] }
 0xb65   : > { %v2212_v37 = vpop.f32.mrb[14].mxu0 }
 0xb66   : > { %v2213_v38 = vadd.f32 %v5180_v35, %v2212_v37  ;;  %v5693_v39 = vpop.f32.mrb[15].mxu0 }
 0xb68   : > { %5706 = vmatpush3.xpose.msk.msra.mxu0 %vm846_vm2, %v2213_v38 }
 0xb69   : > { %5710 = vmatprep.subr.mxu0 %v6202_v11 }
 0xb6b   : > { %5708 = vmatmul.mubr.msk.f32.vlgmr.msra.gmra.mrb[16].mxu0 %vm846_vm2, %v2130_v40 }
 0xb6c   : > { %5712 = vmatprep.mubr.msk.f32.mxu0 %vm6201_vm0, %v6202_v11  ;;  %5711 = vmatpush3.msra.mxu0 %v2296_v58  ;;  %v5205_v58 = vld [vmem:[%s7157_s25 + $0x90] sm:$0xff] }
 0xb6d   : > { %6039 = vmatprep.subr.bf16.mxu0 %v6200_v3 }
 0xc3e   : > { %v2371_v47 = vpop.f32.mrb[16].mxu0 }
 0xc3f   : > { %v5709_v48 = vpop.f32.mrb[17].mxu0  ;;  %v2375_v49 = vsel %vm846_vm2, %v2371_v47, -inf }
 0xc40   : > { %2376 = vmax.xlane.f32.xlu0 %v2375_v49 }
 0xccd   : > { %v2377_v50 = vpop.xlane.xlu0 %2376 }
 0xcce   : > { %v2378_v51 = vsub.f32 %v2371_v47, %v2377_v50 }
 0xcd0   : > { %v2379_v52 = vmul.f32 1.442695, %v2378_v51 }
 0xcd2   : > { %6164 = vpow2.f32 %v2379_v52  ;;  %v5203_v52 = vld [vmem:[%s7157_s25 + $0x80] sm:$0xff] }
 0xcdc   : > { %v6165_v53 = vpop.eup %6164 }
 0xcdd   : > { %v2381_v54 = vsel %vm846_vm2, %v6165_v53, 0.0 }
 0xcde   : > { %2382 = vadd.xlane.f32.xlu1 %v2381_v54 }
 0xd6b   : > { %v2383_v60 = vpop.xlane.xlu1 %2382 }
 0xd6c   : > { %6166 = vrcp.f32 %v2383_v60  ;;  %v6055_v60 = vpack.c.bf16 %v5206_v59, %v5205_v58  ;;  %v5237_v59 = vld [vmem:[%s7156_s1 + $0xb0] sm:$0xff] }
 0xd76   : > { %v6167_v61 = vpop.eup %6166 }
 0xd77   : > { %v2385_v62 = vmul.f32 %v6167_v61, %v6165_v53  ;;  %v5204_v53 = vld [vmem:[%s7157_s25 + $0x88] sm:$0xff]  ;;  %v5212_v61 = vld [vmem:[%s7156_s1 + $0x90] sm:$0xff] }
 0xd78   : > { %v6052_v54 = vpack.c.bf16 %v5204_v53, %v5203_v52 }
 0xd79   : > { %5713 = vmatmul.mubr.msk.f32.vlgmr.msra.gmra.mrb[18].mxu0 %vm846_vm2, %v2385_v62  ;;  %v5213_v62 = vld [vmem:[%s7156_s1 + $0x98] sm:$0xff] }
 0xd7a   : > { %5728 = vmatprep.mubr.msk.f32.mxu0 %vm6201_vm0, %v6202_v11  ;;  %6041 = vmatpush3.bf16.msra.mxu0 %v6040_v18  ;;  %v5228_v18 = vld [vmem:[%s7157_s25 + $0xa0] sm:$0xff] }
 0xd7b   : > { %6042 = vmatprep.subr.bf16.mxu0 %v6200_v3 }
 0xe4c   : > { %v2455_v63 = vpop.f32.mrb[18].mxu0 }
 0xe4d   : > { %v5714_v0 = vpop.f32.mrb[19].mxu0  ;;  %5718 = vmatmul.mubr.msk.f32.vlgmr.msra.gmra.mrb[26].mxu1 %vm846_vm2, %v2455_v63  ;;  %v6061_v63 = vpack.c.bf16 %v5213_v62, %v5212_v61 }
 0xe4e   : > { %5739 = vmatprep.mubr.msk.f32.mxu1 %vm6201_vm0, %v6202_v11  ;;  %6047 = vmatpush3.bf16.msra.mxu1 %v6046_v23  ;;  %v5242_v23 = vld [vmem:[%s7133_s5 + $0xa0] sm:$0xff] }
 0xe4f   : > { %6048 = vmatprep.subr.bf16.mxu1 %v6200_v3 }
 0xf20   : > { %v2530_v1 = vpop.f32.mrb[26].mxu1 }
 0xf21   : > { %v2534_v4 = vadd.f32 %v2530_v1, %v2049_v33  ;;  %v5719_v5 = vpop.f32.mrb[27].mxu1  ;;  %v2661_v33 = vld [vmem:[%s7141_s13 + $0x10] sm:$0xff] }
 0xf22   : > { %v6049_v35 = vpack.c.bf16 %v2662_v34, %v2661_v33  ;;  %v5201_v5 = vld [vmem:[%s7143_s15] ss:$0 sm:$0xff] }
 0xf23   : > { %v2542_v6 = vadd.f32 %v5194_v2, %v2534_v4 }
 0xf24   : > { %6050 = vmatpush3.bf16.msra.mxu1 %v6049_v35 }
 0xf25   : > { %v2543_v7 = vadd.f32 %v2542_v6, %v6351_v14  ;;  %v2576_v14 = vld [vmem:[%s7139_s11 + $0x10] sm:$0xff]  ;;  %6057 = vmatprep.subr.bf16.mxu1 %v6200_v3 }
 0xf26   : > { %v6043_v20 = vpack.c.bf16 %v2577_v19, %v2576_v14  ;;  %v5229_v14 = vld [vmem:[%s7157_s25 + $0xa8] sm:$0xff] }
 0xf27   : > { %v2544_v8 = vsel %vm610_vm1, %v2543_v7, 0.0  ;;  %v6070_v19 = vpack.c.bf16 %v5229_v14, %v5228_v18 }
 0xf28   : > { %2545 = vadd.xlane.f32.xlu0 %v2544_v8  ;;  %6044 = vmatpush3.bf16.msra.mxu0 %v6043_v20  ;;  %v5218_v8 = vld [vmem:[%s7133_s5 + $0x88] sm:$0xff]  ;;  %v5230_v20 = vld [vmem:[%s7157_s25 + $0xb0] sm:$0xff] }
 0xf29   : > { %6051 = vmatprep.subr.bf16.mxu0 %v6200_v3  ;;  %v6073_v22 = vpack.c.bf16 %v5231_v21, %v5230_v20 }
 0xfb5   : > { %v2546_v9 = vpop.xlane.xlu0 %2545 }
 0xfb6   : > { %v2548_v10 = vmul.f32 0.03125, %v2546_v9  ;;  %v5202_v9 = vld [vmem:[%s7144_s16] ss:$0 sm:$0xff] }
 0xfb8   : > { %v2549_v12 = vsub.f32 %v2543_v7, %v2548_v10  ;;  %v5217_v7 = vld [vmem:[%s7133_s5 + $0x80] sm:$0xff] }
 0xfba   : > { %v2550_v13 = vmul.f32 %v2549_v12, %v2549_v12 }
 0xfbc   : > { %v2551_v15 = vsel %vm610_vm1, %v2550_v13, 0.0 }
 0xfbd   : > { %2552 = vadd.xlane.f32.xlu1 %v2551_v15  ;;  %v5219_v15 = vld [vmem:[%s7133_s5 + $0x90] sm:$0xff] }
 0xfbe   : > { %v6067_v17 = vpack.c.bf16 %v5220_v16, %v5219_v15 }
0x104a   : > { %v2553_v24 = vpop.xlane.xlu1 %2552 }
0x104b   : > { %v2554_v25 = vmul.f32 0.03125, %v2553_v24  ;;  %v5243_v24 = vld [vmem:[%s7133_s5 + $0xa8] sm:$0xff] }
0x104d   : > { %v2555_v26 = vadd.f32 1e-05, %v2554_v25  ;;  %v6082_v25 = vpack.c.bf16 %v5243_v24, %v5242_v23  ;;  %v5227_v23 = vld [vmem:[%s7135_s7 + $0x20] sm:$0xff] }
0x104e   : > { %v5262_v24 = vld [vmem:[%s7156_s1 + $0xc0] sm:$0xff] }
0x104f   : > { %6168 = vrsqrt.f32 %v2555_v26  ;;  %v5244_v26 = vld [vmem:[%s7133_s5 + $0xb0] sm:$0xff] }
0x1059   : > { %v6169_v27 = vpop.eup %6168 }
0x105a   : > { %v2557_v29 = vmul.f32 %v6169_v27, %v2549_v12  ;;  %v6064_v12 = vpack.c.bf16 %v5218_v8, %v5217_v7  ;;  %v5245_v27 = vld [vmem:[%s7133_s5 + $0xb8] sm:$0xff] }
0x105c   : > { %v2565_v31 = vmul.f32 %v5195_v28, %v2557_v29  ;;  %v6085_v28 = vpack.c.bf16 %v5245_v27, %v5244_v26  ;;  %v5215_v29 = vld [vmem:[%s7132_s4 + $0x4] ss:$0 sm:$0xff]  ;;  %v5264_v27 = vld [vmem:[%s7156_s1 + $0xd0] sm:$0xff] }
0x105e   : > { %v2573_v32 = vadd.f32 %v5196_v30, %v2565_v31 }
0x1060   : > { %5729 = vmatmul.mubr.msk.f32.vlgmr.msra.gmra.mrb[20].mxu0 %vm610_vm1, %v2573_v32 }
0x1061   : > { %5750 = vmatprep.mubr.msk.f32.mxu0 %vm6201_vm0, %v6202_v11  ;;  %6053 = vmatpush3.bf16.msra.mxu0 %v6052_v54  ;;  %v5235_v54 = vld [vmem:[%s7156_s1 + $0xa0] sm:$0xff] }
0x1062   : > { %6054 = vmatprep.subr.bf16.mxu0 %v6200_v3 }
0x1065   : > { %6056 = vmatpush3.bf16.msra.mxu0 %v6055_v60  ;;  %v5238_v60 = vld [vmem:[%s7156_s1 + $0xb8] sm:$0xff] }
0x1066   : > { %6063 = vmatprep.subr.bf16.mxu0 %v6200_v3  ;;  %v6079_v61 = vpack.c.bf16 %v5238_v60, %v5237_v59 }
0x1133   : > { %v2654_v37 = vpop.f32.mrb[20].mxu0 }
0x1134   : > { %v2655_v38 = vadd.f32 %v5197_v36, %v2654_v37  ;;  %v5730_v39 = vpop.f32.mrb[21].mxu0  ;;  %v5222_v37 = vld [vmem:[%s7134_s6 + $0x4] ss:$0 sm:$0xff] }
0x1136   : > { %v2658_v40 = vmax.f32 %v2655_v38, 0.0 }
0x1138   : > { %5740 = vmatmul.mubr.msk.f32.vlgmr.msra.gmra.mrb[28].mxu1 %vm610_vm1, %v2658_v40 }
0x1139   : > { %5761 = vmatprep.mubr.msk.f32.mxu1 %vm6201_vm0, %v6202_v11  ;;  %6059 = vmatpush3.bf16.msra.mxu1 %v6058_v57  ;;  %v6076_v57 = vpack.c.bf16 %v5236_v55, %v5235_v54 }
0x113a   : > { %6060 = vmatprep.subr.bf16.mxu1 %v6200_v3 }
0x113d   : > { %6062 = vmatpush3.bf16.msra.mxu1 %v6061_v63 }
0x113e   : > { %5775 = vmatprep.subr.mxu1 %v6202_v11 }
0x120b   : > { %v2739_v42 = vpop.f32.mrb[28].mxu1 }
0x120c   : > { %v2740_v43 = vadd.f32 %v5199_v41, %v2739_v42  ;;  %v5741_v44 = vpop.f32.mrb[29].mxu1 }
0x120e   : > { %v2743_v45 = vadd.f32 %v2740_v43, %v2573_v32  ;;  %v5208_v32 = vld [vmem:[%s7159_s2 + $0x4] ss:$0 sm:$0xff] }
0x1210   : > { %v2744_v46 = vsel %vm610_vm1, %v2743_v45, 0.0 }
0x1211   : > { %2745 = vadd.xlane.f32.xlu0 %v2744_v46 }
0x129e   : > { %v2746_v47 = vpop.xlane.xlu0 %2745 }
0x129f   : > { %v2747_v48 = vmul.f32 0.03125, %v2746_v47 }
0x12a1   : > { %v2748_v49 = vsub.f32 %v2743_v45, %v2747_v48 }
0x12a3   : > { %v2749_v50 = vmul.f32 %v2748_v49, %v2748_v49 }
0x12a5   : > { %v2750_v51 = vsel %vm610_vm1, %v2749_v50, 0.0 }
0x12a6   : > { %2751 = vadd.xlane.f32.xlu1 %v2750_v51 }
0x1333   : > { %v2752_v0 = vpop.xlane.xlu1 %2751 }
0x1334   : > { %v2753_v1 = vmul.f32 0.03125, %v2752_v0  ;;  %v5240_v0 = vld [vmem:[%s7132_s4 + $0x5] ss:$0 sm:$0xff] }
0x1336   : > { %v2754_v2 = vadd.f32 1e-05, %v2753_v1 }
0x1338   : > { %6170 = vrsqrt.f32 %v2754_v2  ;;  %v5233_v2 = vld [vmem:[%s7159_s2 + $0x5] ss:$0 sm:$0xff] }
0x1342   : > { %v6171_v4 = vpop.eup %6170 }
0x1343   : > { %v2756_v6 = vmul.f32 %v6171_v4, %v2748_v49 }
0x1345   : > { %v2764_v10 = vmul.f32 %v5201_v5, %v2756_v6  ;;  %v5247_v6 = vld [vmem:[%s7134_s6 + $0x5] ss:$0 sm:$0xff] }
0x1347   : > { %v6751_v13 = vadd.f32 %v5202_v9, %v2764_v10 }
0x1349   : > { %5751 = vmatmul.mubr.msk.f32.vlgmr.msra.gmra.mrb[22].mxu0 %vm610_vm1, %v6751_v13  ;;  %5762 = vmatmul.mubr.msk.f32.vlgmr.msra.gmra.mrb[30].mxu1 %vm610_vm1, %v6751_v13 }
0x134a   : > { %6065 = vmatpush3.bf16.msra.mxu0 %v6064_v12  ;;  %5772 = vmatprep.mubr.msk.f32.mxu0 %vm6201_vm0, %v6202_v11 }
0x134b   : > { %6066 = vmatprep.subr.bf16.mxu0 %v6200_v3  ;;  %5777 = vmatprep.mubr.msk.f32.mxu1 %vm6201_vm0, %v6202_v11 }
0x134e   : > { %6068 = vmatpush3.bf16.msra.mxu0 %v6067_v17 }
0x134f   : > { %6069 = vmatprep.subr.bf16.mxu0 %v6200_v3 }
0x1351   : > { %5773 = vmatmul.mubr.msk.f32.vlgmr.msra.gmra.mrb[24].mxu0 %vm610_vm1, %v6751_v13 }
0x1352   : > { %6071 = vmatpush3.bf16.msra.mxu0 %v6070_v19  ;;  %5793 = vmatprep.mubr.msk.f32.mxu0 %vm6201_vm0, %v6202_v11  ;;  %v5252_v19 = vld [vmem:[%s7135_s7 + $0x28] sm:$0xff] }
0x1353   : > { %6072 = vmatprep.subr.bf16.mxu0 %v6200_v3 }
0x1356   : > { %6074 = vmatpush3.bf16.msra.mxu0 %v6073_v22 }
0x1357   : > { %6081 = vmatprep.subr.bf16.mxu0 %v6200_v3 }
0x1359   : > { %5794 = vmatmul.mubr.msk.f32.vlgmr.msra.gmra.mrb[26].mxu0 %vm610_vm1, %v6751_v13 }
0x135a   : > { %6083 = vmatpush3.bf16.msra.mxu0 %v6082_v25  ;;  %5815 = vmatprep.mubr.msk.f32.mxu0 %vm6201_vm0, %v6202_v11  ;;  %v5263_v25 = vld [vmem:[%s7156_s1 + $0xc8] sm:$0xff] }
0x135b   : > { %6084 = vmatprep.subr.bf16.mxu0 %v6200_v3  ;;  %v6094_v26 = vpack.c.bf16 %v5263_v25, %v5262_v24  ;;  %v5288_v24 = vld [vmem:[%s7156_s1 + $0xe0] sm:$0xff]  ;;  %v5289_v25 = vld [vmem:[%s7156_s1 + $0xe8] sm:$0xff] }
0x135e   : > { %6086 = vmatpush3.bf16.msra.mxu0 %v6085_v28  ;;  %v5265_v28 = vld [vmem:[%s7156_s1 + $0xd8] sm:$0xff] }
0x135f   : > { %5828 = vmatprep.subr.mxu0 %v6202_v11 }
0x1361   : > { %5816 = vmatmul.mubr.msk.f32.vlgmr.msra.gmra.mrb[28].mxu0 %vm610_vm1, %v6751_v13 }
0x1362   : > { %5830 = vmatprep.mubr.msk.f32.mxu0 %vm6201_vm0, %v6202_v11  ;;  %5829 = vmatpush3.msra.mxu0 %v5252_v19  ;;  %v5296_v19 = vld [vmem:[%s7133_s5 + $0xe8] sm:$0xff] }
0x1363   : > { %6087 = vmatprep.subr.bf16.mxu0 %v6200_v3 }
0x141c   : > { %v2855_v30 = vpop.f32.mrb[22].mxu0  ;;  %v2938_v31 = vpop.f32.mrb[30].mxu1 }
0x141d   : > { %v2939_v33 = vadd.f32 %v5215_v29, %v2938_v31  ;;  %v5752_v34 = vpop.f32.mrb[23].mxu0  ;;  %v5763_v35 = vpop.f32.mrb[31].mxu1  ;;  %v2856_v36 = vadd.f32 %v5208_v32, %v2855_v30  ;;  %v6097_v29 = vpack.c.bf16 %v5265_v28, %v5264_v27  ;;  %v5255_v30 = vld [vmem:[%s7157_s25 + $0xc0] sm:$0xff]  ;;  %v5256_v31 = vld [vmem:[%s7157_s25 + $0xc8] sm:$0xff]  ;;  %v5290_v27 = vld [vmem:[%s7156_s1 + $0xf0] sm:$0xff] }
0x141e   : > { %v6088_v32 = vpack.c.bf16 %v5256_v31, %v5255_v30  ;;  %v5258_v34 = vld [vmem:[%s7157_s25 + $0xd8] sm:$0xff] }
0x141f   : > { %5776 = vmatpush3.xpose.msk.msra.mxu1 %vm846_vm2, %v2939_v33  ;;  %v5257_v33 = vld [vmem:[%s7157_s25 + $0xd0] sm:$0xff]  ;;  %v5291_v28 = vld [vmem:[%s7156_s1 + $0xf8] sm:$0xff] }
0x1420   : > { %5780 = vmatprep.subr.mxu1 %v6202_v11  ;;  %v6115_v31 = vpack.c.bf16 %v5291_v28, %v5290_v27 }
0x1422   : > { %5778 = vmatmul.mubr.msk.f32.vlgmr.msra.gmra.mrb[32].mxu1 %vm846_vm2, %v2856_v36 }
0x1423   : > { %5782 = vmatprep.mubr.msk.f32.mxu1 %vm6201_vm0, %v6202_v11 }
0x1424   : > { %v3021_v38 = vpop.f32.mrb[24].mxu0 }
0x1425   : > { %v3022_v39 = vadd.f32 %v5222_v37, %v3021_v38  ;;  %v5774_v40 = vpop.f32.mrb[25].mxu0  ;;  %v6091_v37 = vpack.c.bf16 %v5258_v34, %v5257_v33  ;;  %v5269_v38 = vld [vmem:[%s7133_s5 + $0xc0] sm:$0xff] }
0x1427   : > { %5781 = vmatpush3.msra.mxu1 %v3022_v39  ;;  %v5270_v39 = vld [vmem:[%s7133_s5 + $0xc8] sm:$0xff] }
0x1428   : > { %6075 = vmatprep.subr.bf16.mxu1 %v6200_v3 }
0x142c   : > { %v3266_v41 = vpop.f32.mrb[26].mxu0 }
0x142d   : > { %v5795_v42 = vpop.f32.mrb[27].mxu0  ;;  %v3267_v7 = vadd.f32 %v5233_v2, %v3266_v41 }
0x142e   : > { %v6100_v42 = vpack.c.bf16 %v5270_v39, %v5269_v38  ;;  %v5293_v39 = vld [vmem:[%s7132_s4 + $0x7] ss:$0 sm:$0xff] }
0x1434   : > { %v3432_v43 = vpop.f32.mrb[28].mxu0 }
0x1435   : > { %v5817_v44 = vpop.f32.mrb[29].mxu0  ;;  %v3433_v8 = vadd.f32 %v5247_v6, %v3432_v43  ;;  %v5271_v43 = vld [vmem:[%s7133_s5 + $0xd0] sm:$0xff] }
0x1436   : > { %v5272_v44 = vld [vmem:[%s7133_s5 + $0xd8] sm:$0xff]  ;;  %v5279_v6 = vld [vmem:[%s7135_s7 + $0x30] sm:$0xff] }
0x14f5   : > { %v3097_v45 = vpop.f32.mrb[32].mxu1 }
0x14f6   : > { %v5779_v46 = vpop.f32.mrb[33].mxu1  ;;  %v3101_v47 = vsel %vm846_vm2, %v3097_v45, -inf }
0x14f7   : > { %3102 = vmax.xlane.f32.xlu0 %v3101_v47  ;;  %v6103_v46 = vpack.c.bf16 %v5272_v44, %v5271_v43  ;;  %v5300_v44 = vld [vmem:[%s7134_s6 + $0x7] ss:$0 sm:$0xff] }
0x1584   : > { %v3103_v48 = vpop.xlane.xlu0 %3102 }
0x1585   : > { %v3104_v49 = vsub.f32 %v3097_v45, %v3103_v48  ;;  %v5267_v45 = vld [vmem:[%s7132_s4 + $0x6] ss:$0 sm:$0xff] }
0x1587   : > { %v3105_v50 = vmul.f32 1.442695, %v3104_v49 }
0x1589   : > { %6172 = vpow2.f32 %v3105_v50 }
0x1593   : > { %v6173_v51 = vpop.eup %6172 }
0x1594   : > { %v3107_v52 = vsel %vm846_vm2, %v6173_v51, 0.0 }
0x1595   : > { %3108 = vadd.xlane.f32.xlu1 %v3107_v52 }
0x1622   : > { %v3109_v53 = vpop.xlane.xlu1 %3108 }
0x1623   : > { %6174 = vrcp.f32 %v3109_v53  ;;  %v5260_v53 = vld [vmem:[%s7159_s2 + $0x6] ss:$0 sm:$0xff] }
0x162d   : > { %v6175_v56 = vpop.eup %6174 }
0x162e   : > { %v3111_v58 = vmul.f32 %v6175_v56, %v6173_v51 }
0x1630   : > { %5783 = vmatmul.mubr.msk.f32.vlgmr.msra.gmra.mrb[34].mxu1 %vm846_vm2, %v3111_v58 }
0x1631   : > { %6077 = vmatpush3.bf16.msra.mxu1 %v6076_v57  ;;  %5804 = vmatprep.mubr.msk.f32.mxu1 %vm6201_vm0, %v6202_v11  ;;  %v5274_v57 = vld [vmem:[%s7134_s6 + $0x6] ss:$0 sm:$0xff] }
0x1632   : > { %6078 = vmatprep.subr.bf16.mxu1 %v6200_v3 }
0x1635   : > { %6080 = vmatpush3.bf16.msra.mxu1 %v6079_v61 }
0x1636   : > { %5818 = vmatprep.subr.mxu1 %v6202_v11 }
0x1638   : > { %5805 = vmatmul.mubr.msk.f32.vlgmr.msra.gmra.mrb[36].mxu1 %vm610_vm1, %v6751_v13 }
0x1639   : > { %5820 = vmatprep.mubr.msk.f32.mxu1 %vm6201_vm0, %v6202_v11 }
0x1703   : > { %v3181_v62 = vpop.f32.mrb[34].mxu1 }
0x1704   : > { %v5784_v63 = vpop.f32.mrb[35].mxu1 }
0x170b   : > { %v3349_v1 = vpop.f32.mrb[36].mxu1 }
0x170c   : > { %v3350_v4 = vadd.f32 %v5240_v0, %v3349_v1  ;;  %v5806_v5 = vpop.f32.mrb[37].mxu1 }
0x170e   : > { %5819 = vmatpush3.xpose.msk.msra.mxu1 %vm846_vm2, %v3350_v4 }
0x170f   : > { %5823 = vmatprep.subr.mxu1 %v6202_v11 }
0x1711   : > { %5821 = vmatmul.mubr.msk.f32.vlgmr.msra.gmra.mrb[38].mxu1 %vm846_vm2, %v3267_v7 }
0x1712   : > { %5824 = vmatpush3.msra.mxu1 %v3433_v8  ;;  %5825 = vmatprep.mubr.msk.f32.mxu1 %vm6201_vm0, %v6202_v11  ;;  %v5281_v8 = vld [vmem:[%s7157_s25 + $0xe0] sm:$0xff] }
0x1713   : > { %5833 = vmatprep.subr.mxu1 %v6202_v11 }
0x17e4   : > { %v3508_v9 = vpop.f32.mrb[38].mxu1 }
0x17e5   : > { %v5822_v10 = vpop.f32.mrb[39].mxu1  ;;  %v3512_v12 = vsel %vm846_vm2, %v3508_v9, -inf }
0x17e6   : > { %3513 = vmax.xlane.f32.xlu0 %v3512_v12 }
0x1873   : > { %v3514_v15 = vpop.xlane.xlu0 %3513 }
0x1874   : > { %v3515_v16 = vsub.f32 %v3508_v9, %v3514_v15  ;;  %v5282_v9 = vld [vmem:[%s7157_s25 + $0xe8] sm:$0xff] }
0x1875   : > { %v6106_v12 = vpack.c.bf16 %v5282_v9, %v5281_v8 }
0x1876   : > { %v3516_v17 = vmul.f32 1.442695, %v3515_v16  ;;  %v5283_v16 = vld [vmem:[%s7157_s25 + $0xf0] sm:$0xff] }
0x1878   : > { %6176 = vpow2.f32 %v3516_v17  ;;  %v5284_v17 = vld [vmem:[%s7157_s25 + $0xf8] sm:$0xff] }
0x1882   : > { %v6177_v18 = vpop.eup %6176 }
0x1883   : > { %v3518_v14 = vsel %vm846_vm2, %v6177_v18, 0.0 }
0x1884   : > { %3519 = vadd.xlane.f32.xlu1 %v3518_v14  ;;  %v5295_v14 = vld [vmem:[%s7133_s5 + $0xe0] sm:$0xff] }
0x1911   : > { %v3520_v20 = vpop.xlane.xlu1 %3519 }
0x1912   : > { %6178 = vrcp.f32 %v3520_v20  ;;  %v6118_v20 = vpack.c.bf16 %v5296_v19, %v5295_v14  ;;  %v5321_v14 = vld [vmem:[%s7141_s13 + $0x28] sm:$0xff] }
0x191c   : > { %v6179_v21 = vpop.eup %6178 }
0x191d   : > { %v3522_v22 = vmul.f32 %v6179_v21, %v6177_v18  ;;  %v6109_v18 = vpack.c.bf16 %v5284_v17, %v5283_v16  ;;  %v5297_v21 = vld [vmem:[%s7133_s5 + $0xf0] sm:$0xff]  ;;  %v5316_v16 = vld [vmem:[%s7139_s11 + $0x38] sm:$0xff] }
0x191f   : > { %5826 = vmatmul.mubr.msk.f32.vlgmr.msra.gmra.mrb[40].mxu1 %vm846_vm2, %v3522_v22  ;;  %v5298_v22 = vld [vmem:[%s7133_s5 + $0xf8] sm:$0xff] }
0x1920   : > { %5834 = vmatpush3.msra.mxu1 %v5227_v23  ;;  %5835 = vmatprep.mubr.msk.f32.mxu1 %vm6201_vm0, %v6202_v11  ;;  %v6121_v23 = vpack.c.bf16 %v5298_v22, %v5297_v21 }
0x1921   : > { %6093 = vmatprep.subr.bf16.mxu1 %v6200_v3 }
0x1923   : > { %5836 = vmatmul.mubr.msk.f32.vlgmr.msra.gmra.mrb[42].mxu1 %vm846_vm2, %v3181_v62 }
0x1924   : > { %6095 = vmatpush3.bf16.msra.mxu1 %v6094_v26  ;;  %5857 = vmatprep.mubr.msk.f32.mxu1 %vm6201_vm0, %v6202_v11  ;;  %v6112_v26 = vpack.c.bf16 %v5289_v25, %v5288_v24  ;;  %v5310_v24 = vld [vmem:[%s7137_s9 + $0x1] ss:$0 sm:$0xff] }
0x1925   : > { %6096 = vmatprep.subr.bf16.mxu1 %v6200_v3 }
0x1928   : > { %6098 = vmatpush3.bf16.msra.mxu1 %v6097_v29 }
0x1929   : > { %5871 = vmatprep.subr.mxu1 %v6202_v11 }
0x192b   : > { %5858 = vmatmul.mubr.msk.f32.vlgmr.msra.gmra.mrb[44].mxu1 %vm610_vm1, %v6751_v13 }
0x192c   : > { %5873 = vmatprep.mubr.msk.f32.mxu1 %vm6201_vm0, %v6202_v11 }
0x19f2   : > { %v3592_v35 = vpop.f32.mrb[40].mxu1 }
0x19f3   : > { %v5827_v36 = vpop.f32.mrb[41].mxu1  ;;  %5831 = vmatmul.mubr.msk.f32.vlgmr.msra.gmra.mrb[30].mxu0 %vm846_vm2, %v3592_v35 }
0x19f4   : > { %6089 = vmatpush3.bf16.msra.mxu0 %v6088_v32  ;;  %5846 = vmatprep.mubr.msk.f32.mxu0 %vm6201_vm0, %v6202_v11 }
0x19f5   : > { %6090 = vmatprep.subr.bf16.mxu0 %v6200_v3 }
0x19f6   : > { %v3740_v40 = vpop.f32.mrb[42].mxu1 }
0x19f7   : > { %v5837_v41 = vpop.f32.mrb[43].mxu1 }
0x19f8   : > { %6092 = vmatpush3.bf16.msra.mxu0 %v6091_v37  ;;  %v5286_v41 = vld [vmem:[%s7159_s2 + $0x7] ss:$0 sm:$0xff] }
0x19f9   : > { %6099 = vmatprep.subr.bf16.mxu0 %v6200_v3 }
0x19fb   : > { %5847 = vmatmul.mubr.msk.f32.vlgmr.msra.gmra.mrb[32].mxu0 %vm610_vm1, %v6751_v13 }
0x19fc   : > { %6101 = vmatpush3.bf16.msra.mxu0 %v6100_v42  ;;  %5868 = vmatprep.mubr.msk.f32.mxu0 %vm6201_vm0, %v6202_v11 }
0x19fd   : > { %6102 = vmatprep.subr.bf16.mxu0 %v6200_v3 }
0x19fe   : > { %v3906_v47 = vpop.f32.mrb[44].mxu1 }
0x19ff   : > { %v3907_v48 = vadd.f32 %v5267_v45, %v3906_v47  ;;  %v5859_v49 = vpop.f32.mrb[45].mxu1 }
0x1a00   : > { %6104 = vmatpush3.bf16.msra.mxu0 %v6103_v46 }
0x1a01   : > { %5872 = vmatpush3.xpose.msk.msra.mxu1 %vm846_vm2, %v3907_v48  ;;  %5881 = vmatprep.subr.mxu0 %v6202_v11 }
0x1a02   : > { %5876 = vmatprep.subr.mxu1 %v6202_v11 }
0x1a03   : > { %5869 = vmatmul.mubr.msk.f32.vlgmr.msra.gmra.mrb[34].mxu0 %vm610_vm1, %v6751_v13 }
0x1a04   : > { %5883 = vmatprep.mubr.msk.f32.mxu0 %vm6201_vm0, %v6202_v11  ;;  %5882 = vmatpush3.msra.mxu0 %v5279_v6 }
0x1a05   : > { %6111 = vmatprep.subr.bf16.mxu0 %v6200_v3 }
0x1ac6   : > { %v3667_v50 = vpop.f32.mrb[30].mxu0 }
0x1ac7   : > { %v6940_v51 = vadd.f32 %v3740_v40, %v3667_v50  ;;  %v5832_v52 = vpop.f32.mrb[31].mxu0 }
0x1ace   : > { %v3823_v54 = vpop.f32.mrb[32].mxu0 }
0x1acf   : > { %v3824_v55 = vadd.f32 %v5260_v53, %v3823_v54  ;;  %v5848_v56 = vpop.f32.mrb[33].mxu0 }
0x1ad1   : > { %5874 = vmatmul.mubr.msk.f32.vlgmr.msra.gmra.mrb[46].mxu1 %vm846_vm2, %v3824_v55  ;;  %v5305_v55 = vld [vmem:[%s7135_s7 + $0x38] sm:$0xff] }
0x1ad2   : > { %5878 = vmatprep.mubr.msk.f32.mxu1 %vm6201_vm0, %v6202_v11 }
0x1ad6   : > { %v3989_v58 = vpop.f32.mrb[34].mxu0 }
0x1ad7   : > { %v3990_v59 = vadd.f32 %v5274_v57, %v3989_v58  ;;  %v5870_v60 = vpop.f32.mrb[35].mxu0 }
0x1ad9   : > { %5877 = vmatpush3.msra.mxu1 %v3990_v59 }
0x1ada   : > { %6105 = vmatprep.subr.bf16.mxu1 %v6200_v3 }
0x1ba4   : > { %v4065_v61 = vpop.f32.mrb[46].mxu1 }
0x1ba5   : > { %v5875_v62 = vpop.f32.mrb[47].mxu1  ;;  %v4069_v63 = vsel %vm846_vm2, %v4065_v61, -inf }
0x1ba6   : > { %4070 = vmax.xlane.f32.xlu0 %v4069_v63  ;;  %v5308_v62 = vld [vmem:[%s7136_s8 + $0x1] ss:$0 sm:$0xff] }
0x1c33   : > { %v4071_v0 = vpop.xlane.xlu0 %4070 }
0x1c34   : > { %v4072_v1 = vsub.f32 %v4065_v61, %v4071_v0 }
0x1c36   : > { %v4073_v2 = vmul.f32 1.442695, %v4072_v1 }
0x1c38   : > { %6180 = vpow2.f32 %v4073_v2 }
0x1c42   : > { %v6181_v4 = vpop.eup %6180 }
0x1c43   : > { %v4075_v5 = vsel %vm846_vm2, %v6181_v4, 0.0 }
0x1c44   : > { %4076 = vadd.xlane.f32.xlu1 %v4075_v5 }
0x1cd1   : > { %v4077_v7 = vpop.xlane.xlu1 %4076 }
0x1cd2   : > { %6182 = vrcp.f32 %v4077_v7 }
0x1cdc   : > { %v6183_v10 = vpop.eup %6182 }
0x1cdd   : > { %v4079_v15 = vmul.f32 %v6183_v10, %v6181_v4  ;;  %v5313_v10 = vld [vmem:[%s7139_s11 + $0x20] sm:$0xff] }
0x1cdf   : > { %5879 = vmatmul.mubr.msk.f32.vlgmr.msra.gmra.mrb[48].mxu1 %vm846_vm2, %v4079_v15 }
0x1ce0   : > { %6107 = vmatpush3.bf16.msra.mxu1 %v6106_v12  ;;  %5894 = vmatprep.mubr.msk.f32.mxu1 %vm6201_vm0, %v6202_v11  ;;  %v5314_v12 = vld [vmem:[%s7139_s11 + $0x28] sm:$0xff] }
0x1ce1   : > { %6108 = vmatprep.subr.bf16.mxu1 %v6200_v3  ;;  %v6124_v15 = vpack.c.bf16 %v5314_v12, %v5313_v10 }
0x1ce4   : > { %6110 = vmatpush3.bf16.msra.mxu1 %v6109_v18  ;;  %v5320_v18 = vld [vmem:[%s7141_s13 + $0x20] sm:$0xff] }
0x1ce5   : > { %6117 = vmatprep.subr.bf16.mxu1 %v6200_v3  ;;  %v6130_v19 = vpack.c.bf16 %v5321_v14, %v5320_v18 }
0x1ce7   : > { %5895 = vmatmul.mubr.msk.f32.vlgmr.msra.gmra.mrb[50].mxu1 %vm610_vm1, %v6751_v13 }
0x1ce8   : > { %6119 = vmatpush3.bf16.msra.mxu1 %v6118_v20  ;;  %5916 = vmatprep.mubr.msk.f32.mxu1 %vm6201_vm0, %v6202_v11 }
0x1ce9   : > { %6120 = vmatprep.subr.bf16.mxu1 %v6200_v3 }
0x1cec   : > { %6122 = vmatpush3.bf16.msra.mxu1 %v6121_v23 }
0x1ced   : > { %5929 = vmatprep.subr.mxu1 %v6202_v11 }
0x1cef   : > { %5917 = vmatmul.mubr.msk.f32.vlgmr.msra.gmra.mrb[52].mxu1 %vm610_vm1, %v6751_v13 }
0x1cf0   : > { %5931 = vmatprep.mubr.msk.f32.mxu1 %vm6201_vm0, %v6202_v11  ;;  %5930 = vmatpush3.msra.mxu1 %v5305_v55 }
0x1cf1   : > { %6129 = vmatprep.subr.bf16.mxu1 %v6200_v3 }
0x1db2   : > { %v4149_v29 = vpop.f32.mrb[48].mxu1 }
0x1db3   : > { %v5880_v30 = vpop.f32.mrb[49].mxu1  ;;  %5884 = vmatmul.mubr.msk.f32.vlgmr.msra.gmra.mrb[36].mxu0 %vm846_vm2, %v4149_v29  ;;  %v5322_v29 = vld [vmem:[%s7141_s13 + $0x30] sm:$0xff] }
0x1db4   : > { %6113 = vmatpush3.bf16.msra.mxu0 %v6112_v26  ;;  %5905 = vmatprep.mubr.msk.f32.mxu0 %vm6201_vm0, %v6202_v11  ;;  %v5312_v26 = vld [vmem:[%s7138_s10 + $0x1] ss:$0 sm:$0xff]  ;;  %v5323_v30 = vld [vmem:[%s7141_s13 + $0x38] sm:$0xff] }
0x1db5   : > { %6114 = vmatprep.subr.bf16.mxu0 %v6200_v3 }
0x1db8   : > { %6116 = vmatpush3.bf16.msra.mxu0 %v6115_v31  ;;  %v6133_v31 = vpack.c.bf16 %v5323_v30, %v5322_v29 }
0x1db9   : > { %5919 = vmatprep.subr.mxu0 %v6202_v11 }
0x1dba   : > { %v4308_v32 = vpop.f32.mrb[50].mxu1 }
0x1dbb   : > { %v5896_v33 = vpop.f32.mrb[51].mxu1  ;;  %5906 = vmatmul.mubr.msk.f32.vlgmr.msra.gmra.mrb[38].mxu0 %vm610_vm1, %v6751_v13  ;;  %v4309_v45 = vadd.f32 %v5286_v41, %v4308_v32  ;;  %v5318_v32 = vld [vmem:[%s7140_s12 + $0x1] ss:$0 sm:$0xff] }
0x1dbc   : > { %5921 = vmatprep.mubr.msk.f32.mxu0 %vm6201_vm0, %v6202_v11 }
0x1dc2   : > { %v4474_v34 = vpop.f32.mrb[52].mxu1 }
0x1dc3   : > { %v5918_v35 = vpop.f32.mrb[53].mxu1  ;;  %v4475_v46 = vadd.f32 %v5300_v44, %v4474_v34 }
0x1e86   : > { %v4224_v36 = vpop.f32.mrb[36].mxu0 }
0x1e87   : > { %v4228_v37 = vadd.f32 %v4224_v36, %v6940_v51  ;;  %v5885_v38 = vpop.f32.mrb[37].mxu0 }
0x1e8e   : > { %v4391_v40 = vpop.f32.mrb[38].mxu0 }
0x1e8f   : > { %v4392_v42 = vadd.f32 %v5293_v39, %v4391_v40  ;;  %v5907_v43 = vpop.f32.mrb[39].mxu0 }
0x1e91   : > { %5920 = vmatpush3.xpose.msk.msra.mxu0 %vm846_vm2, %v4392_v42 }
0x1e92   : > { %5924 = vmatprep.subr.mxu0 %v6202_v11 }
0x1e94   : > { %5922 = vmatmul.mubr.msk.f32.vlgmr.msra.gmra.mrb[40].mxu0 %vm846_vm2, %v4309_v45 }
0x1e95   : > { %5925 = vmatpush3.msra.mxu0 %v4475_v46  ;;  %5926 = vmatprep.mubr.msk.f32.mxu0 %vm6201_vm0, %v6202_v11 }
0x1e96   : > { %6123 = vmatprep.subr.bf16.mxu0 %v6200_v3 }
0x1f67   : > { %v4550_v47 = vpop.f32.mrb[40].mxu0 }
0x1f68   : > { %v5923_v48 = vpop.f32.mrb[41].mxu0  ;;  %v4554_v49 = vsel %vm846_vm2, %v4550_v47, -inf }
0x1f69   : > { %4555 = vmax.xlane.f32.xlu0 %v4554_v49  ;;  %v4961_v48 = vld [vmem:[%s7145_s17 + $0x8] sm:$0xff] }
0x1ff6   : > { %v4556_v50 = vpop.xlane.xlu0 %4555 }
0x1ff7   : > { %v4557_v51 = vsub.f32 %v4550_v47, %v4556_v50  ;;  %v4960_v47 = vld [vmem:[%s7145_s17] sm:$0xff]  ;;  %v4962_v50 = vld [vmem:[%s7145_s17 + $0x10] sm:$0xff] }
0x1ff8   : > { %v6136_v49 = vpack.c.bf16 %v4961_v48, %v4960_v47 }
0x1ff9   : > { %v4558_v52 = vmul.f32 1.442695, %v4557_v51  ;;  %v4963_v51 = vld [vmem:[%s7145_s17 + $0x18] sm:$0xff] }
0x1ffb   : > { %6184 = vpow2.f32 %v4558_v52  ;;  %v6139_v52 = vpack.c.bf16 %v4963_v51, %v4962_v50 }
0x2005   : > { %v6185_v53 = vpop.eup %6184 }
0x2006   : > { %v4560_v54 = vsel %vm846_vm2, %v6185_v53, 0.0 }
0x2007   : > { %4561 = vadd.xlane.f32.xlu1 %v4560_v54 }
0x2094   : > { %v4562_v56 = vpop.xlane.xlu1 %4561 }
0x2095   : > { %6186 = vrcp.f32 %v4562_v56 }
0x209f   : > { %v6187_v57 = vpop.eup %6186 }
0x20a0   : > { %v4564_v58 = vmul.f32 %v6187_v57, %v6185_v53 }
0x20a2   : > { %5927 = vmatmul.mubr.msk.f32.vlgmr.msra.gmra.mrb[42].mxu0 %vm846_vm2, %v4564_v58  ;;  %v5330_v58 = vld [vmem:[%s7144_s16 + $0x1] ss:$0 sm:$0xff] }
0x20a3   : > { %5942 = vmatprep.mubr.msk.f32.mxu0 %vm6201_vm0, %v6202_v11  ;;  %6125 = vmatpush3.bf16.msra.mxu0 %v6124_v15 }
0x20a4   : > { %6126 = vmatprep.subr.bf16.mxu0 %v6200_v3 }
0x2175   : > { %v4634_v59 = vpop.f32.mrb[42].mxu0 }
0x2176   : > { %v5928_v60 = vpop.f32.mrb[43].mxu0  ;;  %5932 = vmatmul.mubr.msk.f32.vlgmr.msra.gmra.mrb[54].mxu1 %vm846_vm2, %v4634_v59 }
0x2177   : > { %5953 = vmatprep.mubr.msk.f32.mxu1 %vm6201_vm0, %v6202_v11  ;;  %6131 = vmatpush3.bf16.msra.mxu1 %v6130_v19 }
0x2178   : > { %6132 = vmatprep.subr.bf16.mxu1 %v6200_v3 }
0x217b   : > { %6134 = vmatpush3.bf16.msra.mxu1 %v6133_v31 }
0x2249   : > { %v4709_v61 = vpop.f32.mrb[54].mxu1 }
0x224a   : > { %v4713_v63 = vadd.f32 %v4709_v61, %v4228_v37  ;;  %v5933_v0 = vpop.f32.mrb[55].mxu1  ;;  %v5331_v61 = vld [vmem:[%s7146_s18] ss:$0 sm:$0xff] }
0x224c   : > { %v4722_v1 = vadd.f32 %v5308_v62, %v4713_v63 }
0x224e   : > { %v4723_v2 = vadd.f32 %v4722_v1, %v6751_v13  ;;  %v5315_v13 = vld [vmem:[%s7139_s11 + $0x30] sm:$0xff] }
0x224f   : > { %v6127_v17 = vpack.c.bf16 %v5316_v16, %v5315_v13 }
0x2250   : > { %v4724_v4 = vsel %vm610_vm1, %v4723_v2, 0.0 }
0x2251   : > { %4725 = vadd.xlane.f32.xlu0 %v4724_v4  ;;  %6128 = vmatpush3.bf16.msra.mxu0 %v6127_v17 }
0x2252   : > { %6135 = vmatprep.subr.bf16.mxu0 %v6200_v3 }
0x22de   : > { %v4726_v5 = vpop.xlane.xlu0 %4725 }
0x22df   : > { %v4727_v6 = vmul.f32 0.03125, %v4726_v5 }
0x22e1   : > { %v4728_v7 = vsub.f32 %v4723_v2, %v4727_v6 }
0x22e3   : > { %v4729_v8 = vmul.f32 %v4728_v7, %v4728_v7 }
0x22e5   : > { %v4730_v9 = vsel %vm610_vm1, %v4729_v8, 0.0 }
0x22e6   : > { %4731 = vadd.xlane.f32.xlu1 %v4730_v9 }
0x2373   : > { %v4732_v20 = vpop.xlane.xlu1 %4731 }
0x2374   : > { %v4733_v21 = vmul.f32 0.03125, %v4732_v20 }
0x2376   : > { %v4734_v22 = vadd.f32 1e-05, %v4733_v21 }
0x2378   : > { %6188 = vrsqrt.f32 %v4734_v22 }
0x2382   : > { %v6189_v23 = vpop.eup %6188 }
0x2383   : > { %v4736_v25 = vmul.f32 %v6189_v23, %v4728_v7 }
0x2385   : > { %v4745_v27 = vmul.f32 %v5310_v24, %v4736_v25 }
0x2387   : > { %v4754_v28 = vadd.f32 %v5312_v26, %v4745_v27 }
0x2389   : > { %5943 = vmatmul.mubr.msk.f32.vlgmr.msra.gmra.mrb[44].mxu0 %vm610_vm1, %v4754_v28 }
0x238a   : > { %5964 = vmatprep.mubr.msk.f32.mxu0 %vm6201_vm0, %v6202_v11  ;;  %v5325_v11 = vld [vmem:[%s7142_s14 + $0x1] ss:$0 sm:$0xff]  ;;  %6137 = vmatpush3.bf16.msra.mxu0 %v6136_v49 }
0x238b   : > { %6138 = vmatprep.subr.bf16.mxu0 %v6200_v3  ;;  %v5328_v3 = vld [vmem:[%s7143_s15 + $0x1] ss:$0 sm:$0xff] }
0x238e   : > { %6140 = vmatpush3.bf16.msra.mxu0 %v6139_v52 }
0x245c   : > { %v4837_v33 = vpop.f32.mrb[44].mxu0 }
0x245d   : > { %v4838_v34 = vadd.f32 %v5318_v32, %v4837_v33  ;;  %v5944_v35 = vpop.f32.mrb[45].mxu0 }
0x245f   : > { %v4841_v36 = vmax.f32 %v4838_v34, 0.0 }
0x2461   : > { %5954 = vmatmul.mubr.msk.f32.vlgmr.msra.gmra.mrb[56].mxu1 %vm610_vm1, %v4841_v36 }
0x2534   : > { %v4924_v37 = vpop.f32.mrb[56].mxu1 }
0x2535   : > { %v4925_v38 = vadd.f32 %v5325_v11, %v4924_v37  ;;  %v5955_v39 = vpop.f32.mrb[57].mxu1 }
0x2537   : > { %v4928_v40 = vadd.f32 %v4925_v38, %v4754_v28 }
0x2539   : > { %v4929_v41 = vsel %vm610_vm1, %v4928_v40, 0.0 }
0x253a   : > { %4930 = vadd.xlane.f32.xlu0 %v4929_v41 }
0x25c7   : > { %v4931_v42 = vpop.xlane.xlu0 %4930 }
0x25c8   : > { %v4932_v43 = vmul.f32 0.03125, %v4931_v42 }
0x25ca   : > { %v4933_v44 = vsub.f32 %v4928_v40, %v4932_v43 }
0x25cc   : > { %v4934_v45 = vmul.f32 %v4933_v44, %v4933_v44 }
0x25ce   : > { %v4935_v46 = vsel %vm610_vm1, %v4934_v45, 0.0 }
0x25cf   : > { %4936 = vadd.xlane.f32.xlu1 %v4935_v46 }
0x265c   : > { %v4937_v53 = vpop.xlane.xlu1 %4936 }
0x265d   : > { %v4938_v54 = vmul.f32 0.03125, %v4937_v53 }
0x265f   : > { %v4939_v55 = vadd.f32 1e-05, %v4938_v54 }
0x2661   : > { %6190 = vrsqrt.f32 %v4939_v55 }
0x266b   : > { %v6191_v56 = vpop.eup %6190 }
0x266c   : > { %v4941_v57 = vmul.f32 %v6191_v56, %v4933_v44 }
0x266e   : > { %v4950_v59 = vmul.f32 %v5328_v3, %v4941_v57 }
0x2670   : > { %v4959_v60 = vadd.f32 %v5330_v58, %v4950_v59 }
0x2672   : > { %5965 = vmatmul.mubr.msk.f32.vlgmr.msra.gmra.mrb[46].mxu0 %vm610_vm1, %v4959_v60 }
0x2745   : > { %v5040_v62 = vpop.f32.mrb[46].mxu0 }
0x2746   : > { %v5041_v63 = vadd.f32 %v5331_v61, %v5040_v62  ;;  %v5966_v0 = vpop.f32.mrb[47].mxu0 }
0x2748   : > { %5045 = vst.msk [vmem:[%s597_s29] sm:$0xff] %vm5044_vm3, %v5041_v63 }
0x2749 PF: > { %s29_s0 = sadd.s32 1, %s6198_s0  }
0x274a   : > { %p26_p4 = scmp.ge.s32.totalorder %s29_s0, 4  }
0x274c   :  { %28 = sbr.rel (!%p26_p4) target bundleno = 5 (0x5), region = 184 }

</bundles_post_ra>
